<compile_context>
chip_gen: v6e
topology: v6e:2x2x1
jax: 0.10.0
libtpu: 0.0.40
codegen_flags: <defaults>
</compile_context>

<pallas_src>
import functools

import jax
import jax.numpy as jnp
from jax.experimental import pallas as pl
from jax.experimental.pallas import tpu as pltpu


def _round_up(x, m):
    return (x + m - 1) // m * m


def _gru_kernel(x_ref, wih_ref, whh_ref, bgi_ref, bhn_ref, out_ref, h_scratch,
                *, seq_len, unroll):
    """One grid step advances the GRU recurrence over TT timesteps for one batch block.

    x_ref    : (TT, BB, I)  mm_dtype  time-major input block
    wih_ref  : (I,  3*Hp)   mm_dtype  input->gates weights, gate slabs [r|z|n]
    whh_ref  : (Hp, 3*Hp)   mm_dtype  hidden->gates weights, gate slabs [r|z|n]
    bgi_ref  : (1, 3*Hp)    f32       (b_ih+b_hh) for r,z and b_ih for n (folded)
    bhn_ref  : (1, Hp)      f32       b_hh of the n gate (must stay inside r*(.))
    out_ref  : (BB, Hp)               last hidden state of this batch block
    h_scratch: (BB, Hp)     f32       hidden state, VMEM-resident across time blocks
    """
    t_blk = pl.program_id(1)
    n_t_blk = pl.num_programs(1)
    tt = x_ref.shape[0]
    bb, hp = h_scratch.shape

    @pl.when(t_blk == 0)
    def _():
        h_scratch[...] = jnp.zeros_like(h_scratch)

    mm_dtype = whh_ref.dtype
    wih = wih_ref[...]                 # loop-invariant loads, hoisted
    whh = whh_ref[...]
    # Hoist bias broadcasts out of the step loop (JAX does not CSE broadcast_in_dim).
    bgi = jnp.broadcast_to(bgi_ref[...], (bb, 3 * hp))
    bhn = jnp.broadcast_to(bhn_ref[...], (bb, hp))

    def make_step(masked):
        def step(i, h):
            # Input projection: independent of h -> rides on otherwise-idle MXU slots.
            gi = jnp.dot(x_ref[i], wih, preferred_element_type=jnp.float32) + bgi
            # Recurrent projection: the only op on the serial dependency chain.
            gh = jnp.dot(h.astype(mm_dtype), whh, preferred_element_type=jnp.float32)
            # Lane-aligned gate slabs (hp is a multiple of 128).
            r = jax.nn.sigmoid(gi[:, :hp] + gh[:, :hp])
            z = jax.nn.sigmoid(gi[:, hp:2 * hp] + gh[:, hp:2 * hp])
            n = jnp.tanh(gi[:, 2 * hp:] + r * (gh[:, 2 * hp:] + bhn))
            h_new = n + z * (h - n)        # == (1-z)*n + z*h, one fewer VPU op
            if masked:
                # Freeze h past the true sequence end (only in the padded tail block).
                h_new = jnp.where(t_blk * tt + i < seq_len, h_new, h)
            return h_new
        return step

    def run_block(masked):
        return jax.lax.fori_loop(0, tt, make_step(masked), h_scratch[...],
                                 unroll=unroll)

    if seq_len % tt == 0:
        h_scratch[...] = run_block(False)
    else:
        # Only the last time block contains padded steps; keep the freeze select off
        # the critical path of every other block.
        @pl.when(t_blk != n_t_blk - 1)
        def _():
            h_scratch[...] = run_block(False)

        @pl.when(t_blk == n_t_blk - 1)
        def _():
            h_scratch[...] = run_block(True)

    @pl.when(t_blk == n_t_blk - 1)
    def _():
        out_ref[...] = h_scratch[...].astype(out_ref.dtype)


def gru_last_hidden(x, w_ih, w_hh, b_ih, b_hh, *, tt=8, unroll=4,
                    matmul_dtype=jnp.bfloat16, batch_blocks=1,
                    single_buffer_weights=True):
    """Last-timestep output of a PyTorch-style nn.GRU (gate order [r | z | n]).

    x: (B, T, I), batch_first. Returns (B, H) == output[:, -1, :].

    tt            : timesteps per grid step (sweep 8-32 for long sequences).
    unroll        : bounded unroll factor for the in-kernel time loop.
    matmul_dtype  : jnp.bfloat16 (default; fast MXU path, f32 accumulation) or
                    jnp.float32 for bit-accurate results.
    batch_blocks  : >1 splits the batch over a "parallel" grid axis (use 2 to occupy
                    both v7x TensorCores; keep 1 on v5e/v6e where it would serialize).
    single_buffer_weights : single-buffer the constant weight/bias blocks via
                    pl.Buffered(1) (halves their VMEM footprint at large H).

    Note: for tiny batches, pack independent sequences (directions/layers) into the
    batch dimension before calling; the per-step MXU latency is paid regardless of M.
    """
    # TODO(synk): dropout=True variant (nn.Dropout(0.5)) not implemented; the module
    # default dropout=False makes dropout_layer an Identity, so it is a no-op here.
    B, T, I = x.shape
    H3 = w_ih.shape[0]
    H = H3 // 3
    assert w_hh.shape == (H3, H) and b_ih.shape == (H3,) and b_hh.shape == (H3,)
    assert batch_blocks >= 1

    mm_dtype = jnp.dtype(matmul_dtype)
    hp = _round_up(H, 128)                        # lane-aligned hidden width
    bp = _round_up(B, 8 * batch_blocks)           # sublane-aligned, evenly splittable
    bb = bp // batch_blocks
    tt = max(1, min(tt, T))
    tp = _round_up(T, tt)
    unroll = max(1, min(unroll, tt))

    # ---- weight re-layout: (3H, K) gate-major -> (K, 3*hp) lane-padded gate slabs.
    def pad_gate_cols(w):
        K = w.shape[1]
        w3 = w.reshape(3, H, K)
        w3p = jnp.zeros((3, hp, K), w.dtype).at[:, :H, :].set(w3)
        return jnp.transpose(w3p, (2, 0, 1)).reshape(K, 3 * hp)

    def pad_gate_bias(b):
        return jnp.zeros((3, hp), jnp.float32).at[:, :H].set(
            b.astype(jnp.float32).reshape(3, H))

    wih_p = pad_gate_cols(w_ih).astype(mm_dtype)                      # (I, 3hp)
    whh_p = jnp.zeros((hp, 3 * hp), mm_dtype).at[:H, :].set(
        pad_gate_cols(w_hh).astype(mm_dtype))                         # (hp, 3hp)

    bih_p = pad_gate_bias(b_ih)
    bhh_p = pad_gate_bias(b_hh)
    # b_hh of the r/z gates folds with b_ih; the n-gate recurrent bias must stay
    # separate (it sits inside r * (.)).
    bgi = jnp.concatenate(
        [bih_p[0] + bhh_p[0], bih_p[1] + bhh_p[1], bih_p[2]]).reshape(1, 3 * hp)
    bhn = bhh_p[2].reshape(1, hp)

    # ---- time-major, padded input. This small copy (T*B*I) is the ONLY padded
    # tensor built outside the kernel; the (T, B, 3H) gate tensor never exists in HBM.
    x_tm = jnp.transpose(x, (1, 0, 2)).astype(mm_dtype)               # (T, B, I)
    x_tm = jnp.zeros((tp, bp, I), mm_dtype).at[:T, :B, :].set(x_tm)

    # Explicit scoped-VMEM budget (defaults: 16 MiB v5e / 32 MiB v6e,v7x).
    mm_b = mm_dtype.itemsize
    n_wbuf = 1 if single_buffer_weights else 2
    est = (2 * tt * bb * I * mm_b                       # x block, double buffered
           + n_wbuf * (I + hp) * 3 * hp * mm_b          # wih + whh
           + n_wbuf * 4 * hp * 4                        # bgi + bhn
           + 2 * bb * hp * x.dtype.itemsize             # output block
           + bb * hp * 4)                               # h scratch
    vmem_limit = int(min(64 * 1024 * 1024, max(32 * 1024 * 1024, 2 * est)))

    kernel = functools.partial(_gru_kernel, seq_len=T, unroll=unroll)
    operands = (x_tm, wih_p, whh_p, bgi, bhn)

    def build(use_single_buffer):
        # Constant index_map => the pipeline never re-DMAs these blocks; Buffered(1)
        # additionally drops the revolving second buffer (halves weight VMEM).
        const_kw = dict(pipeline_mode=pl.Buffered(1)) if use_single_buffer else {}
        return pl.pallas_call(
            kernel,
            out_shape=jax.ShapeDtypeStruct((bp, hp), x.dtype),
            grid_spec=pltpu.PrefetchScalarGridSpec(
                num_scalar_prefetch=0,
                grid=(batch_blocks, tp // tt),
                in_specs=[
                    pl.BlockSpec((tt, bb, I), lambda b, t: (t, b, 0)),
                    pl.BlockSpec((I, 3 * hp), lambda b, t: (0, 0), **const_kw),
                    pl.BlockSpec((hp, 3 * hp), lambda b, t: (0, 0), **const_kw),
                    pl.BlockSpec((1, 3 * hp), lambda b, t: (0, 0), **const_kw),
                    pl.BlockSpec((1, hp), lambda b, t: (0, 0), **const_kw),
                ],
                out_specs=pl.BlockSpec((bb, hp), lambda b, t: (b, 0)),
                scratch_shapes=[pltpu.VMEM((bb, hp), jnp.float32)],
            ),
            compiler_params=pltpu.CompilerParams(
                dimension_semantics=("parallel", "arbitrary"),
                vmem_limit_bytes=vmem_limit,
            ),
        )

    if single_buffer_weights:
        try:
            out = build(True)(*operands)
        except Exception:
            # Fallback for jax builds without BlockSpec.pipeline_mode / Buffered(1):
            # default double buffering, correctness unaffected.
            out = build(False)(*operands)
    else:
        out = build(False)(*operands)

    # Padded batch rows / hidden columns are dropped here (padded batch rows evolve
    # to nonzero values inside the kernel; they are never read back).
    return out[:B, :H]


def gru_last_hidden_ref(x, w_ih, w_hh, b_ih, b_hh):
    """Pure-JAX reference (PyTorch nn.GRU semantics, batch_first, last_only)."""
    B, T, I = x.shape
    H = w_hh.shape[1]

    def step(h, x_t):
        gi = x_t @ w_ih.T + b_ih
        gh = h @ w_hh.T + b_hh
        i_r, i_z, i_n = gi[:, :H], gi[:, H:2 * H], gi[:, 2 * H:]
        h_r, h_z, h_n = gh[:, :H], gh[:, H:2 * H], gh[:, 2 * H:]
        r = jax.nn.sigmoid(i_r + h_r)
        z = jax.nn.sigmoid(i_z + h_z)
        n = jnp.tanh(i_n + r * h_n)
        return (1.0 - z) * n + z * h, None

    h0 = jnp.zeros((B, H), jnp.float32)
    h_last, _ = jax.lax.scan(step, h0, jnp.transpose(x, (1, 0, 2)))
    return h_last


if __name__ == "__main__":
    # Shapes consistent with the module's forward: x = (batch, seq, input_size)
    batch, seq, input_size, hidden_size = 4, 8, 16, 32

    key = jax.random.PRNGKey(0)
    k_x, k_wih, k_whh, k_bih, k_bhh = jax.random.split(key, 5)

    x = jax.random.normal(k_x, (batch, seq, input_size), dtype=jnp.float32)

    # PyTorch nn.GRU init: uniform(-1/sqrt(H), 1/sqrt(H)), gate order [r | z | n]
    bound = 1.0 / (hidden_size ** 0.5)
    w_ih = jax.random.uniform(k_wih, (3 * hidden_size, input_size),
                              minval=-bound, maxval=bound, dtype=jnp.float32)
    w_hh = jax.random.uniform(k_whh, (3 * hidden_size, hidden_size),
                              minval=-bound, maxval=bound, dtype=jnp.float32)
    b_ih = jax.random.uniform(k_bih, (3 * hidden_size,),
                              minval=-bound, maxval=bound, dtype=jnp.float32)
    b_hh = jax.random.uniform(k_bhh, (3 * hidden_size,),
                              minval=-bound, maxval=bound, dtype=jnp.float32)

    ref = jax.block_until_ready(gru_last_hidden_ref(x, w_ih, w_hh, b_ih, b_hh))

    # 1) f32 matmuls, multiple time blocks (tt | T).
    out = jax.block_until_ready(
        gru_last_hidden(x, w_ih, w_hh, b_ih, b_hh, tt=4, matmul_dtype=jnp.float32))
    assert out.shape == (batch, hidden_size)
    assert jnp.allclose(out, ref, atol=3e-5, rtol=3e-5), "f32 path mismatch"

    # 2) f32, T % tt != 0: exercises the padded-tail freeze path (last block only).
    out_tail = jax.block_until_ready(
        gru_last_hidden(x, w_ih, w_hh, b_ih, b_hh, tt=3, matmul_dtype=jnp.float32))
    assert jnp.allclose(out_tail, ref, atol=3e-5, rtol=3e-5), "tail path mismatch"

    # 3) f32, batch split across a "parallel" grid axis (v7x two-TensorCore layout).
    out_bb = jax.block_until_ready(
        gru_last_hidden(x, w_ih, w_hh, b_ih, b_hh, tt=4, matmul_dtype=jnp.float32,
                        batch_blocks=2))
    assert jnp.allclose(out_bb, ref, atol=3e-5, rtol=3e-5), "batch-parallel mismatch"

    # 4) Default bf16 MXU fast path (f32 accumulation): looser tolerance.
    out_bf16 = jax.block_until_ready(
        gru_last_hidden(x, w_ih, w_hh, b_ih, b_hh, tt=8))
    assert jnp.allclose(out_bf16, ref, atol=3e-2, rtol=3e-2), "bf16 path mismatch"

    print("KERNEL_OK")
</pallas_src>

<mosaic_0001>
module attributes {stable_mosaic.version = 11 : i64} {
  func.func @_gru_kernel(%arg0: i32, %arg1: i32, %arg2: memref<4x8x16xf32, #tpu.memory_space<vmem>>, %arg3: memref<16x384xf32, #tpu.memory_space<vmem>>, %arg4: memref<128x384xf32, #tpu.memory_space<vmem>>, %arg5: memref<1x384xf32, #tpu.memory_space<vmem>>, %arg6: memref<1x128xf32, #tpu.memory_space<vmem>>, %arg7: memref<8x128xf32, #tpu.memory_space<vmem>>, %arg8: memref<8x128xf32, #tpu.memory_space<vmem>>) attributes {dimension_semantics = [#tpu.dimension_semantics<parallel>, #tpu.dimension_semantics<arbitrary>], iteration_bounds = array<i64: 1, 2>, scalar_prefetch = 0 : i64, scratch_operands = 1 : i64, tpu.core_type = #tpu.core_type<tc>, window_params = [{transform_indices = @transform_0, window_bounds = array<i64: 4, 8, 16>}, {pipeline_mode = #tpu.pipeline_mode<synchronous>, transform_indices = @transform_1, window_bounds = array<i64: 16, 384>}, {pipeline_mode = #tpu.pipeline_mode<synchronous>, transform_indices = @transform_2, window_bounds = array<i64: 128, 384>}, {pipeline_mode = #tpu.pipeline_mode<synchronous>, transform_indices = @transform_3, window_bounds = array<i64: 1, 384>}, {pipeline_mode = #tpu.pipeline_mode<synchronous>, transform_indices = @transform_4, window_bounds = array<i64: 1, 128>}, {transform_indices = @transform_5, window_bounds = array<i64: 8, 128>}]} {
    %c0_i32 = arith.constant 0 : i32
    %0 = arith.cmpi eq, %arg1, %c0_i32 : i32
    %1 = arith.extui %0 : i1 to i32
    %c0_i32_0 = arith.constant 0 : i32
    %2 = arith.cmpi ne, %1, %c0_i32_0 : i32
    scf.if %2 {
      %cst_38 = arith.constant 0.000000e+00 : f32
      %140 = vector.broadcast %cst_38 : f32 to vector<8x128xf32>
      %c0_39 = arith.constant 0 : index
      %c0_40 = arith.constant 0 : index
      %141 = vector.load %arg8[%c0_39, %c0_40] : memref<8x128xf32, #tpu.memory_space<vmem>>, vector<8x128xf32>
      tpu.vector_store %arg8[%c0_39, %c0_40], %140 {strides = array<i32>} : memref<8x128xf32, #tpu.memory_space<vmem>>, vector<8x128xf32>,
    } else {
    }
    %c0 = arith.constant 0 : index
    %c0_1 = arith.constant 0 : index
    %3 = vector.load %arg3[%c0, %c0_1] : memref<16x384xf32, #tpu.memory_space<vmem>>, vector<16x384xf32>
    %c0_2 = arith.constant 0 : index
    %c0_3 = arith.constant 0 : index
    %4 = vector.load %arg4[%c0_2, %c0_3] : memref<128x384xf32, #tpu.memory_space<vmem>>, vector<128x384xf32>
    %c0_4 = arith.constant 0 : index
    %c0_5 = arith.constant 0 : index
    %5 = vector.load %arg5[%c0_4, %c0_5] : memref<1x384xf32, #tpu.memory_space<vmem>>, vector<1x384xf32>
    %6 = vector.shape_cast %5 : vector<1x384xf32> to vector<1x384xf32>
    %7 = vector.broadcast %6 : vector<1x384xf32> to vector<8x384xf32>
    %c0_6 = arith.constant 0 : index
    %c0_7 = arith.constant 0 : index
    %8 = vector.load %arg6[%c0_6, %c0_7] : memref<1x128xf32, #tpu.memory_space<vmem>>, vector<1x128xf32>
    %9 = vector.shape_cast %8 : vector<1x128xf32> to vector<1x128xf32>
    %10 = vector.broadcast %9 : vector<1x128xf32> to vector<8x128xf32>
    %c0_8 = arith.constant 0 : index
    %c0_9 = arith.constant 0 : index
    %11 = vector.load %arg8[%c0_8, %c0_9] : memref<8x128xf32, #tpu.memory_space<vmem>>, vector<8x128xf32>
    %c0_i32_10 = arith.constant 0 : i32
    %12 = arith.index_cast %c0_i32_10 : i32 to index
    %c0_11 = arith.constant 0 : index
    %c0_12 = arith.constant 0 : index
    %13 = vector.load %arg2[%12, %c0_11, %c0_12] : memref<4x8x16xf32, #tpu.memory_space<vmem>>, vector<1x8x16xf32>
    %14 = vector.shape_cast %13 : vector<1x8x16xf32> to vector<8x16xf32>
    %cst = arith.constant dense<0.000000e+00> : vector<8x384xf32>
    %15 = tpu.matmul %14, %3, %cst {dimension_numbers = #tpu.dot_dimension_numbers<[1], [0], [0], [1], [0, 0, 1, 1], [], []>} : vector<8x16xf32>, vector<16x384xf32>, vector<8x384xf32> -> vector<8x384xf32>
    %16 = arith.addf %15, %7 : vector<8x384xf32>
    %cst_13 = arith.constant dense<0.000000e+00> : vector<8x384xf32>
    %17 = tpu.matmul %11, %4, %cst_13 {dimension_numbers = #tpu.dot_dimension_numbers<[1], [0], [0], [1], [0, 0, 1, 1], [], []>} : vector<8x128xf32>, vector<128x384xf32>, vector<8x384xf32> -> vector<8x384xf32>
    %18 = vector.extract_strided_slice %16 {offsets = [0, 0], sizes = [8, 128], strides = [1, 1]} : vector<8x384xf32> to vector<8x128xf32>
    %19 = vector.extract_strided_slice %17 {offsets = [0, 0], sizes = [8, 128], strides = [1, 1]} : vector<8x384xf32> to vector<8x128xf32>
    %20 = arith.addf %18, %19 : vector<8x128xf32>
    %21 = arith.negf %20 : vector<8x128xf32>
    %22 = math.exp %21 : vector<8x128xf32>
    %cst_14 = arith.constant 1.000000e+00 : f32
    %23 = vector.broadcast %cst_14 : f32 to vector<8x128xf32>
    %24 = arith.addf %23, %22 : vector<8x128xf32>
    %25 = arith.divf %23, %24 : vector<8x128xf32>
    %26 = vector.extract_strided_slice %16 {offsets = [0, 128], sizes = [8, 128], strides = [1, 1]} : vector<8x384xf32> to vector<8x128xf32>
    %27 = vector.extract_strided_slice %17 {offsets = [0, 128], sizes = [8, 128], strides = [1, 1]} : vector<8x384xf32> to vector<8x128xf32>
    %28 = arith.addf %26, %27 : vector<8x128xf32>
    %29 = arith.negf %28 : vector<8x128xf32>
    %30 = math.exp %29 : vector<8x128xf32>
    %cst_15 = arith.constant 1.000000e+00 : f32
    %31 = vector.broadcast %cst_15 : f32 to vector<8x128xf32>
    %32 = arith.addf %31, %30 : vector<8x128xf32>
    %33 = arith.divf %31, %32 : vector<8x128xf32>
    %34 = vector.extract_strided_slice %16 {offsets = [0, 256], sizes = [8, 128], strides = [1, 1]} : vector<8x384xf32> to vector<8x128xf32>
    %35 = vector.extract_strided_slice %17 {offsets = [0, 256], sizes = [8, 128], strides = [1, 1]} : vector<8x384xf32> to vector<8x128xf32>
    %36 = arith.addf %35, %10 : vector<8x128xf32>
    %37 = arith.mulf %25, %36 : vector<8x128xf32>
    %38 = arith.addf %34, %37 : vector<8x128xf32>
    %39 = math.tanh %38 : vector<8x128xf32>
    %40 = arith.subf %11, %39 : vector<8x128xf32>
    %41 = arith.mulf %33, %40 : vector<8x128xf32>
    %42 = arith.addf %39, %41 : vector<8x128xf32>
    %c1_i32 = arith.constant 1 : i32
    %43 = arith.index_cast %c1_i32 : i32 to index
    %c0_16 = arith.constant 0 : index
    %c0_17 = arith.constant 0 : index
    %44 = vector.load %arg2[%43, %c0_16, %c0_17] : memref<4x8x16xf32, #tpu.memory_space<vmem>>, vector<1x8x16xf32>
    %45 = vector.shape_cast %44 : vector<1x8x16xf32> to vector<8x16xf32>
    %cst_18 = arith.constant dense<0.000000e+00> : vector<8x384xf32>
    %46 = tpu.matmul %45, %3, %cst_18 {dimension_numbers = #tpu.dot_dimension_numbers<[1], [0], [0], [1], [0, 0, 1, 1], [], []>} : vector<8x16xf32>, vector<16x384xf32>, vector<8x384xf32> -> vector<8x384xf32>
    %47 = arith.addf %46, %7 : vector<8x384xf32>
    %cst_19 = arith.constant dense<0.000000e+00> : vector<8x384xf32>
    %48 = tpu.matmul %42, %4, %cst_19 {dimension_numbers = #tpu.dot_dimension_numbers<[1], [0], [0], [1], [0, 0, 1, 1], [], []>} : vector<8x128xf32>, vector<128x384xf32>, vector<8x384xf32> -> vector<8x384xf32>
    %49 = vector.extract_strided_slice %47 {offsets = [0, 0], sizes = [8, 128], strides = [1, 1]} : vector<8x384xf32> to vector<8x128xf32>
    %50 = vector.extract_strided_slice %48 {offsets = [0, 0], sizes = [8, 128], strides = [1, 1]} : vector<8x384xf32> to vector<8x128xf32>
    %51 = arith.addf %49, %50 : vector<8x128xf32>
    %52 = arith.negf %51 : vector<8x128xf32>
    %53 = math.exp %52 : vector<8x128xf32>
    %cst_20 = arith.constant 1.000000e+00 : f32
    %54 = vector.broadcast %cst_20 : f32 to vector<8x128xf32>
    %55 = arith.addf %54, %53 : vector<8x128xf32>
    %56 = arith.divf %54, %55 : vector<8x128xf32>
    %57 = vector.extract_strided_slice %47 {offsets = [0, 128], sizes = [8, 128], strides = [1, 1]} : vector<8x384xf32> to vector<8x128xf32>
    %58 = vector.extract_strided_slice %48 {offsets = [0, 128], sizes = [8, 128], strides = [1, 1]} : vector<8x384xf32> to vector<8x128xf32>
    %59 = arith.addf %57, %58 : vector<8x128xf32>
    %60 = arith.negf %59 : vector<8x128xf32>
    %61 = math.exp %60 : vector<8x128xf32>
    %cst_21 = arith.constant 1.000000e+00 : f32
    %62 = vector.broadcast %cst_21 : f32 to vector<8x128xf32>
    %63 = arith.addf %62, %61 : vector<8x128xf32>
    %64 = arith.divf %62, %63 : vector<8x128xf32>
    %65 = vector.extract_strided_slice %47 {offsets = [0, 256], sizes = [8, 128], strides = [1, 1]} : vector<8x384xf32> to vector<8x128xf32>
    %66 = vector.extract_strided_slice %48 {offsets = [0, 256], sizes = [8, 128], strides = [1, 1]} : vector<8x384xf32> to vector<8x128xf32>
    %67 = arith.addf %66, %10 : vector<8x128xf32>
    %68 = arith.mulf %56, %67 : vector<8x128xf32>
    %69 = arith.addf %65, %68 : vector<8x128xf32>
    %70 = math.tanh %69 : vector<8x128xf32>
    %71 = arith.subf %42, %70 : vector<8x128xf32>
    %72 = arith.mulf %64, %71 : vector<8x128xf32>
    %73 = arith.addf %70, %72 : vector<8x128xf32>
    %c2_i32 = arith.constant 2 : i32
    %74 = arith.index_cast %c2_i32 : i32 to index
    %c0_22 = arith.constant 0 : index
    %c0_23 = arith.constant 0 : index
    %75 = vector.load %arg2[%74, %c0_22, %c0_23] : memref<4x8x16xf32, #tpu.memory_space<vmem>>, vector<1x8x16xf32>
    %76 = vector.shape_cast %75 : vector<1x8x16xf32> to vector<8x16xf32>
    %cst_24 = arith.constant dense<0.000000e+00> : vector<8x384xf32>
    %77 = tpu.matmul %76, %3, %cst_24 {dimension_numbers = #tpu.dot_dimension_numbers<[1], [0], [0], [1], [0, 0, 1, 1], [], []>} : vector<8x16xf32>, vector<16x384xf32>, vector<8x384xf32> -> vector<8x384xf32>
    %78 = arith.addf %77, %7 : vector<8x384xf32>
    %cst_25 = arith.constant dense<0.000000e+00> : vector<8x384xf32>
    %79 = tpu.matmul %73, %4, %cst_25 {dimension_numbers = #tpu.dot_dimension_numbers<[1], [0], [0], [1], [0, 0, 1, 1], [], []>} : vector<8x128xf32>, vector<128x384xf32>, vector<8x384xf32> -> vector<8x384xf32>
    %80 = vector.extract_strided_slice %78 {offsets = [0, 0], sizes = [8, 128], strides = [1, 1]} : vector<8x384xf32> to vector<8x128xf32>
    %81 = vector.extract_strided_slice %79 {offsets = [0, 0], sizes = [8, 128], strides = [1, 1]} : vector<8x384xf32> to vector<8x128xf32>
    %82 = arith.addf %80, %81 : vector<8x128xf32>
    %83 = arith.negf %82 : vector<8x128xf32>
    %84 = math.exp %83 : vector<8x128xf32>
    %cst_26 = arith.constant 1.000000e+00 : f32
    %85 = vector.broadcast %cst_26 : f32 to vector<8x128xf32>
    %86 = arith.addf %85, %84 : vector<8x128xf32>
    %87 = arith.divf %85, %86 : vector<8x128xf32>
    %88 = vector.extract_strided_slice %78 {offsets = [0, 128], sizes = [8, 128], strides = [1, 1]} : vector<8x384xf32> to vector<8x128xf32>
    %89 = vector.extract_strided_slice %79 {offsets = [0, 128], sizes = [8, 128], strides = [1, 1]} : vector<8x384xf32> to vector<8x128xf32>
    %90 = arith.addf %88, %89 : vector<8x128xf32>
    %91 = arith.negf %90 : vector<8x128xf32>
    %92 = math.exp %91 : vector<8x128xf32>
    %cst_27 = arith.constant 1.000000e+00 : f32
    %93 = vector.broadcast %cst_27 : f32 to vector<8x128xf32>
    %94 = arith.addf %93, %92 : vector<8x128xf32>
    %95 = arith.divf %93, %94 : vector<8x128xf32>
    %96 = vector.extract_strided_slice %78 {offsets = [0, 256], sizes = [8, 128], strides = [1, 1]} : vector<8x384xf32> to vector<8x128xf32>
    %97 = vector.extract_strided_slice %79 {offsets = [0, 256], sizes = [8, 128], strides = [1, 1]} : vector<8x384xf32> to vector<8x128xf32>
    %98 = arith.addf %97, %10 : vector<8x128xf32>
    %99 = arith.mulf %87, %98 : vector<8x128xf32>
    %100 = arith.addf %96, %99 : vector<8x128xf32>
    %101 = math.tanh %100 : vector<8x128xf32>
    %102 = arith.subf %73, %101 : vector<8x128xf32>
    %103 = arith.mulf %95, %102 : vector<8x128xf32>
    %104 = arith.addf %101, %103 : vector<8x128xf32>
    %c3_i32 = arith.constant 3 : i32
    %105 = arith.index_cast %c3_i32 : i32 to index
    %c0_28 = arith.constant 0 : index
    %c0_29 = arith.constant 0 : index
    %106 = vector.load %arg2[%105, %c0_28, %c0_29] : memref<4x8x16xf32, #tpu.memory_space<vmem>>, vector<1x8x16xf32>
    %107 = vector.shape_cast %106 : vector<1x8x16xf32> to vector<8x16xf32>
    %cst_30 = arith.constant dense<0.000000e+00> : vector<8x384xf32>
    %108 = tpu.matmul %107, %3, %cst_30 {dimension_numbers = #tpu.dot_dimension_numbers<[1], [0], [0], [1], [0, 0, 1, 1], [], []>} : vector<8x16xf32>, vector<16x384xf32>, vector<8x384xf32> -> vector<8x384xf32>
    %109 = arith.addf %108, %7 : vector<8x384xf32>
    %cst_31 = arith.constant dense<0.000000e+00> : vector<8x384xf32>
    %110 = tpu.matmul %104, %4, %cst_31 {dimension_numbers = #tpu.dot_dimension_numbers<[1], [0], [0], [1], [0, 0, 1, 1], [], []>} : vector<8x128xf32>, vector<128x384xf32>, vector<8x384xf32> -> vector<8x384xf32>
    %111 = vector.extract_strided_slice %109 {offsets = [0, 0], sizes = [8, 128], strides = [1, 1]} : vector<8x384xf32> to vector<8x128xf32>
    %112 = vector.extract_strided_slice %110 {offsets = [0, 0], sizes = [8, 128], strides = [1, 1]} : vector<8x384xf32> to vector<8x128xf32>
    %113 = arith.addf %111, %112 : vector<8x128xf32>
    %114 = arith.negf %113 : vector<8x128xf32>
    %115 = math.exp %114 : vector<8x128xf32>
    %cst_32 = arith.constant 1.000000e+00 : f32
    %116 = vector.broadcast %cst_32 : f32 to vector<8x128xf32>
    %117 = arith.addf %116, %115 : vector<8x128xf32>
    %118 = arith.divf %116, %117 : vector<8x128xf32>
    %119 = vector.extract_strided_slice %109 {offsets = [0, 128], sizes = [8, 128], strides = [1, 1]} : vector<8x384xf32> to vector<8x128xf32>
    %120 = vector.extract_strided_slice %110 {offsets = [0, 128], sizes = [8, 128], strides = [1, 1]} : vector<8x384xf32> to vector<8x128xf32>
    %121 = arith.addf %119, %120 : vector<8x128xf32>
    %122 = arith.negf %121 : vector<8x128xf32>
    %123 = math.exp %122 : vector<8x128xf32>
    %cst_33 = arith.constant 1.000000e+00 : f32
    %124 = vector.broadcast %cst_33 : f32 to vector<8x128xf32>
    %125 = arith.addf %124, %123 : vector<8x128xf32>
    %126 = arith.divf %124, %125 : vector<8x128xf32>
    %127 = vector.extract_strided_slice %109 {offsets = [0, 256], sizes = [8, 128], strides = [1, 1]} : vector<8x384xf32> to vector<8x128xf32>
    %128 = vector.extract_strided_slice %110 {offsets = [0, 256], sizes = [8, 128], strides = [1, 1]} : vector<8x384xf32> to vector<8x128xf32>
    %129 = arith.addf %128, %10 : vector<8x128xf32>
    %130 = arith.mulf %118, %129 : vector<8x128xf32>
    %131 = arith.addf %127, %130 : vector<8x128xf32>
    %132 = math.tanh %131 : vector<8x128xf32>
    %133 = arith.subf %104, %132 : vector<8x128xf32>
    %134 = arith.mulf %126, %133 : vector<8x128xf32>
    %135 = arith.addf %132, %134 : vector<8x128xf32>
    %c4_i32 = arith.constant 4 : i32
    %c0_34 = arith.constant 0 : index
    %c0_35 = arith.constant 0 : index
    %136 = vector.load %arg8[%c0_34, %c0_35] : memref<8x128xf32, #tpu.memory_space<vmem>>, vector<8x128xf32>
    tpu.vector_store %arg8[%c0_34, %c0_35], %135 {strides = array<i32>} : memref<8x128xf32, #tpu.memory_space<vmem>>, vector<8x128xf32>,
    %c1_i32_36 = arith.constant 1 : i32
    %137 = arith.cmpi eq, %arg1, %c1_i32_36 : i32
    %138 = arith.extui %137 : i1 to i32
    %c0_i32_37 = arith.constant 0 : i32
    %139 = arith.cmpi ne, %138, %c0_i32_37 : i32
    scf.if %139 {
      %c0_38 = arith.constant 0 : index
      %c0_39 = arith.constant 0 : index
      %140 = vector.load %arg8[%c0_38, %c0_39] : memref<8x128xf32, #tpu.memory_space<vmem>>, vector<8x128xf32>
      %c0_40 = arith.constant 0 : index
      %c0_41 = arith.constant 0 : index
      %141 = vector.load %arg7[%c0_40, %c0_41] : memref<8x128xf32, #tpu.memory_space<vmem>>, vector<8x128xf32>
      tpu.vector_store %arg7[%c0_40, %c0_41], %140 {strides = array<i32>} : memref<8x128xf32, #tpu.memory_space<vmem>>, vector<8x128xf32>,
    } else {
    }
    return
  }
  func.func @transform_0(%arg0: i32, %arg1: i32) -> (i32, i32, i32) {
    %c0_i32 = arith.constant 0 : i32
    %c0_i32_0 = arith.constant 0 : i32
    return %arg1, %arg0, %c0_i32 : i32, i32, i32
  }
  func.func @transform_1(%arg0: i32, %arg1: i32) -> (i32, i32) {
    %c0_i32 = arith.constant 0 : i32
    %c0_i32_0 = arith.constant 0 : i32
    %c0_i32_1 = arith.constant 0 : i32
    return %c0_i32, %c0_i32_0 : i32, i32
  }
  func.func @transform_2(%arg0: i32, %arg1: i32) -> (i32, i32) {
    %c0_i32 = arith.constant 0 : i32
    %c0_i32_0 = arith.constant 0 : i32
    %c0_i32_1 = arith.constant 0 : i32
    return %c0_i32, %c0_i32_0 : i32, i32
  }
  func.func @transform_3(%arg0: i32, %arg1: i32) -> (i32, i32) {
    %c0_i32 = arith.constant 0 : i32
    %c0_i32_0 = arith.constant 0 : i32
    %c0_i32_1 = arith.constant 0 : i32
    return %c0_i32, %c0_i32_0 : i32, i32
  }
  func.func @transform_4(%arg0: i32, %arg1: i32) -> (i32, i32) {
    %c0_i32 = arith.constant 0 : i32
    %c0_i32_0 = arith.constant 0 : i32
    %c0_i32_1 = arith.constant 0 : i32
    return %c0_i32, %c0_i32_0 : i32, i32
  }
  func.func @transform_5(%arg0: i32, %arg1: i32) -> (i32, i32) {
    %c0_i32 = arith.constant 0 : i32
    %c0_i32_0 = arith.constant 0 : i32
    return %arg0, %c0_i32 : i32, i32
  }
}

module attributes {stable_mosaic.version = 11 : i64} {
  func.func @_gru_kernel(%arg0: i32, %arg1: i32, %arg2: memref<4x8x16xf32, #tpu.memory_space<vmem>>, %arg3: memref<16x384xf32, #tpu.memory_space<vmem>>, %arg4: memref<128x384xf32, #tpu.memory_space<vmem>>, %arg5: memref<1x384xf32, #tpu.memory_space<vmem>>, %arg6: memref<1x128xf32, #tpu.memory_space<vmem>>, %arg7: memref<8x128xf32, #tpu.memory_space<vmem>>, %arg8: memref<8x128xf32, #tpu.memory_space<vmem>>) attributes {dimension_semantics = [#tpu.dimension_semantics<parallel>, #tpu.dimension_semantics<arbitrary>], iteration_bounds = array<i64: 1, 2>, scalar_prefetch = 0 : i64, scratch_operands = 1 : i64, tpu.core_type = #tpu.core_type<tc>, window_params = [{transform_indices = @transform_0, window_bounds = array<i64: 4, 8, 16>}, {pipeline_mode = #tpu.pipeline_mode<synchronous>, transform_indices = @transform_1, window_bounds = array<i64: 16, 384>}, {pipeline_mode = #tpu.pipeline_mode<synchronous>, transform_indices = @transform_2, window_bounds = array<i64: 128, 384>}, {pipeline_mode = #tpu.pipeline_mode<synchronous>, transform_indices = @transform_3, window_bounds = array<i64: 1, 384>}, {pipeline_mode = #tpu.pipeline_mode<synchronous>, transform_indices = @transform_4, window_bounds = array<i64: 1, 128>}, {transform_indices = @transform_5, window_bounds = array<i64: 8, 128>}]} {
    %c0_i32 = arith.constant 0 : i32
    %0 = arith.cmpi eq, %arg1, %c0_i32 : i32
    %1 = arith.extui %0 : i1 to i32
    %c0_i32_0 = arith.constant 0 : i32
    %2 = arith.cmpi ne, %1, %c0_i32_0 : i32
    scf.if %2 {
      %cst_38 = arith.constant 0.000000e+00 : f32
      %140 = vector.broadcast %cst_38 : f32 to vector<8x128xf32>
      %c0_39 = arith.constant 0 : index
      %c0_40 = arith.constant 0 : index
      %141 = vector.load %arg8[%c0_39, %c0_40] : memref<8x128xf32, #tpu.memory_space<vmem>>, vector<8x128xf32>
      tpu.vector_store %arg8[%c0_39, %c0_40], %140 {strides = array<i32>} : memref<8x128xf32, #tpu.memory_space<vmem>>, vector<8x128xf32>,
    } else {
    }
    %c0 = arith.constant 0 : index
    %c0_1 = arith.constant 0 : index
    %3 = vector.load %arg3[%c0, %c0_1] : memref<16x384xf32, #tpu.memory_space<vmem>>, vector<16x384xf32>
    %c0_2 = arith.constant 0 : index
    %c0_3 = arith.constant 0 : index
    %4 = vector.load %arg4[%c0_2, %c0_3] : memref<128x384xf32, #tpu.memory_space<vmem>>, vector<128x384xf32>
    %c0_4 = arith.constant 0 : index
    %c0_5 = arith.constant 0 : index
    %5 = vector.load %arg5[%c0_4, %c0_5] : memref<1x384xf32, #tpu.memory_space<vmem>>, vector<1x384xf32>
    %6 = vector.shape_cast %5 : vector<1x384xf32> to vector<1x384xf32>
    %7 = vector.broadcast %6 : vector<1x384xf32> to vector<8x384xf32>
    %c0_6 = arith.constant 0 : index
    %c0_7 = arith.constant 0 : index
    %8 = vector.load %arg6[%c0_6, %c0_7] : memref<1x128xf32, #tpu.memory_space<vmem>>, vector<1x128xf32>
    %9 = vector.shape_cast %8 : vector<1x128xf32> to vector<1x128xf32>
    %10 = vector.broadcast %9 : vector<1x128xf32> to vector<8x128xf32>
    %c0_8 = arith.constant 0 : index
    %c0_9 = arith.constant 0 : index
    %11 = vector.load %arg8[%c0_8, %c0_9] : memref<8x128xf32, #tpu.memory_space<vmem>>, vector<8x128xf32>
    %c0_i32_10 = arith.constant 0 : i32
    %12 = arith.index_cast %c0_i32_10 : i32 to index
    %c0_11 = arith.constant 0 : index
    %c0_12 = arith.constant 0 : index
    %13 = vector.load %arg2[%12, %c0_11, %c0_12] : memref<4x8x16xf32, #tpu.memory_space<vmem>>, vector<1x8x16xf32>
    %14 = vector.shape_cast %13 : vector<1x8x16xf32> to vector<8x16xf32>
    %cst = arith.constant dense<0.000000e+00> : vector<8x384xf32>
    %15 = tpu.matmul %14, %3, %cst {dimension_numbers = #tpu.dot_dimension_numbers<[1], [0], [0], [1], [0, 0, 1, 1], [], []>} : vector<8x16xf32>, vector<16x384xf32>, vector<8x384xf32> -> vector<8x384xf32>
    %16 = arith.addf %15, %7 : vector<8x384xf32>
    %cst_13 = arith.constant dense<0.000000e+00> : vector<8x384xf32>
    %17 = tpu.matmul %11, %4, %cst_13 {dimension_numbers = #tpu.dot_dimension_numbers<[1], [0], [0], [1], [0, 0, 1, 1], [], []>} : vector<8x128xf32>, vector<128x384xf32>, vector<8x384xf32> -> vector<8x384xf32>
    %18 = vector.extract_strided_slice %16 {offsets = [0, 0], sizes = [8, 128], strides = [1, 1]} : vector<8x384xf32> to vector<8x128xf32>
    %19 = vector.extract_strided_slice %17 {offsets = [0, 0], sizes = [8, 128], strides = [1, 1]} : vector<8x384xf32> to vector<8x128xf32>
    %20 = arith.addf %18, %19 : vector<8x128xf32>
    %21 = arith.negf %20 : vector<8x128xf32>
    %22 = math.exp %21 : vector<8x128xf32>
    %cst_14 = arith.constant 1.000000e+00 : f32
    %23 = vector.broadcast %cst_14 : f32 to vector<8x128xf32>
    %24 = arith.addf %23, %22 : vector<8x128xf32>
    %25 = arith.divf %23, %24 : vector<8x128xf32>
    %26 = vector.extract_strided_slice %16 {offsets = [0, 128], sizes = [8, 128], strides = [1, 1]} : vector<8x384xf32> to vector<8x128xf32>
    %27 = vector.extract_strided_slice %17 {offsets = [0, 128], sizes = [8, 128], strides = [1, 1]} : vector<8x384xf32> to vector<8x128xf32>
    %28 = arith.addf %26, %27 : vector<8x128xf32>
    %29 = arith.negf %28 : vector<8x128xf32>
    %30 = math.exp %29 : vector<8x128xf32>
    %cst_15 = arith.constant 1.000000e+00 : f32
    %31 = vector.broadcast %cst_15 : f32 to vector<8x128xf32>
    %32 = arith.addf %31, %30 : vector<8x128xf32>
    %33 = arith.divf %31, %32 : vector<8x128xf32>
    %34 = vector.extract_strided_slice %16 {offsets = [0, 256], sizes = [8, 128], strides = [1, 1]} : vector<8x384xf32> to vector<8x128xf32>
    %35 = vector.extract_strided_slice %17 {offsets = [0, 256], sizes = [8, 128], strides = [1, 1]} : vector<8x384xf32> to vector<8x128xf32>
    %36 = arith.addf %35, %10 : vector<8x128xf32>
    %37 = arith.mulf %25, %36 : vector<8x128xf32>
    %38 = arith.addf %34, %37 : vector<8x128xf32>
    %39 = math.tanh %38 : vector<8x128xf32>
    %40 = arith.subf %11, %39 : vector<8x128xf32>
    %41 = arith.mulf %33, %40 : vector<8x128xf32>
    %42 = arith.addf %39, %41 : vector<8x128xf32>
    %c1_i32 = arith.constant 1 : i32
    %43 = arith.index_cast %c1_i32 : i32 to index
    %c0_16 = arith.constant 0 : index
    %c0_17 = arith.constant 0 : index
    %44 = vector.load %arg2[%43, %c0_16, %c0_17] : memref<4x8x16xf32, #tpu.memory_space<vmem>>, vector<1x8x16xf32>
    %45 = vector.shape_cast %44 : vector<1x8x16xf32> to vector<8x16xf32>
    %cst_18 = arith.constant dense<0.000000e+00> : vector<8x384xf32>
    %46 = tpu.matmul %45, %3, %cst_18 {dimension_numbers = #tpu.dot_dimension_numbers<[1], [0], [0], [1], [0, 0, 1, 1], [], []>} : vector<8x16xf32>, vector<16x384xf32>, vector<8x384xf32> -> vector<8x384xf32>
    %47 = arith.addf %46, %7 : vector<8x384xf32>
    %cst_19 = arith.constant dense<0.000000e+00> : vector<8x384xf32>
    %48 = tpu.matmul %42, %4, %cst_19 {dimension_numbers = #tpu.dot_dimension_numbers<[1], [0], [0], [1], [0, 0, 1, 1], [], []>} : vector<8x128xf32>, vector<128x384xf32>, vector<8x384xf32> -> vector<8x384xf32>
    %49 = vector.extract_strided_slice %47 {offsets = [0, 0], sizes = [8, 128], strides = [1, 1]} : vector<8x384xf32> to vector<8x128xf32>
    %50 = vector.extract_strided_slice %48 {offsets = [0, 0], sizes = [8, 128], strides = [1, 1]} : vector<8x384xf32> to vector<8x128xf32>
    %51 = arith.addf %49, %50 : vector<8x128xf32>
    %52 = arith.negf %51 : vector<8x128xf32>
    %53 = math.exp %52 : vector<8x128xf32>
    %cst_20 = arith.constant 1.000000e+00 : f32
    %54 = vector.broadcast %cst_20 : f32 to vector<8x128xf32>
    %55 = arith.addf %54, %53 : vector<8x128xf32>
    %56 = arith.divf %54, %55 : vector<8x128xf32>
    %57 = vector.extract_strided_slice %47 {offsets = [0, 128], sizes = [8, 128], strides = [1, 1]} : vector<8x384xf32> to vector<8x128xf32>
    %58 = vector.extract_strided_slice %48 {offsets = [0, 128], sizes = [8, 128], strides = [1, 1]} : vector<8x384xf32> to vector<8x128xf32>
    %59 = arith.addf %57, %58 : vector<8x128xf32>
    %60 = arith.negf %59 : vector<8x128xf32>
    %61 = math.exp %60 : vector<8x128xf32>
    %cst_21 = arith.constant 1.000000e+00 : f32
    %62 = vector.broadcast %cst_21 : f32 to vector<8x128xf32>
    %63 = arith.addf %62, %61 : vector<8x128xf32>
    %64 = arith.divf %62, %63 : vector<8x128xf32>
    %65 = vector.extract_strided_slice %47 {offsets = [0, 256], sizes = [8, 128], strides = [1, 1]} : vector<8x384xf32> to vector<8x128xf32>
    %66 = vector.extract_strided_slice %48 {offsets = [0, 256], sizes = [8, 128], strides = [1, 1]} : vector<8x384xf32> to vector<8x128xf32>
    %67 = arith.addf %66, %10 : vector<8x128xf32>
    %68 = arith.mulf %56, %67 : vector<8x128xf32>
    %69 = arith.addf %65, %68 : vector<8x128xf32>
    %70 = math.tanh %69 : vector<8x128xf32>
    %71 = arith.subf %42, %70 : vector<8x128xf32>
    %72 = arith.mulf %64, %71 : vector<8x128xf32>
    %73 = arith.addf %70, %72 : vector<8x128xf32>
    %c2_i32 = arith.constant 2 : i32
    %74 = arith.index_cast %c2_i32 : i32 to index
    %c0_22 = arith.constant 0 : index
    %c0_23 = arith.constant 0 : index
    %75 = vector.load %arg2[%74, %c0_22, %c0_23] : memref<4x8x16xf32, #tpu.memory_space<vmem>>, vector<1x8x16xf32>
    %76 = vector.shape_cast %75 : vector<1x8x16xf32> to vector<8x16xf32>
    %cst_24 = arith.constant dense<0.000000e+00> : vector<8x384xf32>
    %77 = tpu.matmul %76, %3, %cst_24 {dimension_numbers = #tpu.dot_dimension_numbers<[1], [0], [0], [1], [0, 0, 1, 1], [], []>} : vector<8x16xf32>, vector<16x384xf32>, vector<8x384xf32> -> vector<8x384xf32>
    %78 = arith.addf %77, %7 : vector<8x384xf32>
    %cst_25 = arith.constant dense<0.000000e+00> : vector<8x384xf32>
    %79 = tpu.matmul %73, %4, %cst_25 {dimension_numbers = #tpu.dot_dimension_numbers<[1], [0], [0], [1], [0, 0, 1, 1], [], []>} : vector<8x128xf32>, vector<128x384xf32>, vector<8x384xf32> -> vector<8x384xf32>
    %80 = vector.extract_strided_slice %78 {offsets = [0, 0], sizes = [8, 128], strides = [1, 1]} : vector<8x384xf32> to vector<8x128xf32>
    %81 = vector.extract_strided_slice %79 {offsets = [0, 0], sizes = [8, 128], strides = [1, 1]} : vector<8x384xf32> to vector<8x128xf32>
    %82 = arith.addf %80, %81 : vector<8x128xf32>
    %83 = arith.negf %82 : vector<8x128xf32>
    %84 = math.exp %83 : vector<8x128xf32>
    %cst_26 = arith.constant 1.000000e+00 : f32
    %85 = vector.broadcast %cst_26 : f32 to vector<8x128xf32>
    %86 = arith.addf %85, %84 : vector<8x128xf32>
    %87 = arith.divf %85, %86 : vector<8x128xf32>
    %88 = vector.extract_strided_slice %78 {offsets = [0, 128], sizes = [8, 128], strides = [1, 1]} : vector<8x384xf32> to vector<8x128xf32>
    %89 = vector.extract_strided_slice %79 {offsets = [0, 128], sizes = [8, 128], strides = [1, 1]} : vector<8x384xf32> to vector<8x128xf32>
    %90 = arith.addf %88, %89 : vector<8x128xf32>
    %91 = arith.negf %90 : vector<8x128xf32>
    %92 = math.exp %91 : vector<8x128xf32>
    %cst_27 = arith.constant 1.000000e+00 : f32
    %93 = vector.broadcast %cst_27 : f32 to vector<8x128xf32>
    %94 = arith.addf %93, %92 : vector<8x128xf32>
    %95 = arith.divf %93, %94 : vector<8x128xf32>
    %96 = vector.extract_strided_slice %78 {offsets = [0, 256], sizes = [8, 128], strides = [1, 1]} : vector<8x384xf32> to vector<8x128xf32>
    %97 = vector.extract_strided_slice %79 {offsets = [0, 256], sizes = [8, 128], strides = [1, 1]} : vector<8x384xf32> to vector<8x128xf32>
    %98 = arith.addf %97, %10 : vector<8x128xf32>
    %99 = arith.mulf %87, %98 : vector<8x128xf32>
    %100 = arith.addf %96, %99 : vector<8x128xf32>
    %101 = math.tanh %100 : vector<8x128xf32>
    %102 = arith.subf %73, %101 : vector<8x128xf32>
    %103 = arith.mulf %95, %102 : vector<8x128xf32>
    %104 = arith.addf %101, %103 : vector<8x128xf32>
    %c3_i32 = arith.constant 3 : i32
    %105 = arith.index_cast %c3_i32 : i32 to index
    %c0_28 = arith.constant 0 : index
    %c0_29 = arith.constant 0 : index
    %106 = vector.load %arg2[%105, %c0_28, %c0_29] : memref<4x8x16xf32, #tpu.memory_space<vmem>>, vector<1x8x16xf32>
    %107 = vector.shape_cast %106 : vector<1x8x16xf32> to vector<8x16xf32>
    %cst_30 = arith.constant dense<0.000000e+00> : vector<8x384xf32>
    %108 = tpu.matmul %107, %3, %cst_30 {dimension_numbers = #tpu.dot_dimension_numbers<[1], [0], [0], [1], [0, 0, 1, 1], [], []>} : vector<8x16xf32>, vector<16x384xf32>, vector<8x384xf32> -> vector<8x384xf32>
    %109 = arith.addf %108, %7 : vector<8x384xf32>
    %cst_31 = arith.constant dense<0.000000e+00> : vector<8x384xf32>
    %110 = tpu.matmul %104, %4, %cst_31 {dimension_numbers = #tpu.dot_dimension_numbers<[1], [0], [0], [1], [0, 0, 1, 1], [], []>} : vector<8x128xf32>, vector<128x384xf32>, vector<8x384xf32> -> vector<8x384xf32>
    %111 = vector.extract_strided_slice %109 {offsets = [0, 0], sizes = [8, 128], strides = [1, 1]} : vector<8x384xf32> to vector<8x128xf32>
    %112 = vector.extract_strided_slice %110 {offsets = [0, 0], sizes = [8, 128], strides = [1, 1]} : vector<8x384xf32> to vector<8x128xf32>
    %113 = arith.addf %111, %112 : vector<8x128xf32>
    %114 = arith.negf %113 : vector<8x128xf32>
    %115 = math.exp %114 : vector<8x128xf32>
    %cst_32 = arith.constant 1.000000e+00 : f32
    %116 = vector.broadcast %cst_32 : f32 to vector<8x128xf32>
    %117 = arith.addf %116, %115 : vector<8x128xf32>
    %118 = arith.divf %116, %117 : vector<8x128xf32>
    %119 = vector.extract_strided_slice %109 {offsets = [0, 128], sizes = [8, 128], strides = [1, 1]} : vector<8x384xf32> to vector<8x128xf32>
    %120 = vector.extract_strided_slice %110 {offsets = [0, 128], sizes = [8, 128], strides = [1, 1]} : vector<8x384xf32> to vector<8x128xf32>
    %121 = arith.addf %119, %120 : vector<8x128xf32>
    %122 = arith.negf %121 : vector<8x128xf32>
    %123 = math.exp %122 : vector<8x128xf32>
    %cst_33 = arith.constant 1.000000e+00 : f32
    %124 = vector.broadcast %cst_33 : f32 to vector<8x128xf32>
    %125 = arith.addf %124, %123 : vector<8x128xf32>
    %126 = arith.divf %124, %125 : vector<8x128xf32>
    %127 = vector.extract_strided_slice %109 {offsets = [0, 256], sizes = [8, 128], strides = [1, 1]} : vector<8x384xf32> to vector<8x128xf32>
    %128 = vector.extract_strided_slice %110 {offsets = [0, 256], sizes = [8, 128], strides = [1, 1]} : vector<8x384xf32> to vector<8x128xf32>
    %129 = arith.addf %128, %10 : vector<8x128xf32>
    %130 = arith.mulf %118, %129 : vector<8x128xf32>
    %131 = arith.addf %127, %130 : vector<8x128xf32>
    %132 = math.tanh %131 : vector<8x128xf32>
    %133 = arith.subf %104, %132 : vector<8x128xf32>
    %134 = arith.mulf %126, %133 : vector<8x128xf32>
    %135 = arith.addf %132, %134 : vector<8x128xf32>
    %c4_i32 = arith.constant 4 : i32
    %c0_34 = arith.constant 0 : index
    %c0_35 = arith.constant 0 : index
    %136 = vector.load %arg8[%c0_34, %c0_35] : memref<8x128xf32, #tpu.memory_space<vmem>>, vector<8x128xf32>
    tpu.vector_store %arg8[%c0_34, %c0_35], %135 {strides = array<i32>} : memref<8x128xf32, #tpu.memory_space<vmem>>, vector<8x128xf32>,
    %c1_i32_36 = arith.constant 1 : i32
    %137 = arith.cmpi eq, %arg1, %c1_i32_36 : i32
    %138 = arith.extui %137 : i1 to i32
    %c0_i32_37 = arith.constant 0 : i32
    %139 = arith.cmpi ne, %138, %c0_i32_37 : i32
    scf.if %139 {
      %c0_38 = arith.constant 0 : index
      %c0_39 = arith.constant 0 : index
      %140 = vector.load %arg8[%c0_38, %c0_39] : memref<8x128xf32, #tpu.memory_space<vmem>>, vector<8x128xf32>
      %c0_40 = arith.constant 0 : index
      %c0_41 = arith.constant 0 : index
      %141 = vector.load %arg7[%c0_40, %c0_41] : memref<8x128xf32, #tpu.memory_space<vmem>>, vector<8x128xf32>
      tpu.vector_store %arg7[%c0_40, %c0_41], %140 {strides = array<i32>} : memref<8x128xf32, #tpu.memory_space<vmem>>, vector<8x128xf32>,
    } else {
    }
    return
  }
  func.func @transform_0(%arg0: i32, %arg1: i32) -> (i32, i32, i32) {
    %c0_i32 = arith.constant 0 : i32
    %c0_i32_0 = arith.constant 0 : i32
    return %arg1, %arg0, %c0_i32 : i32, i32, i32
  }
  func.func @transform_1(%arg0: i32, %arg1: i32) -> (i32, i32) {
    %c0_i32 = arith.constant 0 : i32
    %c0_i32_0 = arith.constant 0 : i32
    %c0_i32_1 = arith.constant 0 : i32
    return %c0_i32, %c0_i32_0 : i32, i32
  }
  func.func @transform_2(%arg0: i32, %arg1: i32) -> (i32, i32) {
    %c0_i32 = arith.constant 0 : i32
    %c0_i32_0 = arith.constant 0 : i32
    %c0_i32_1 = arith.constant 0 : i32
    return %c0_i32, %c0_i32_0 : i32, i32
  }
  func.func @transform_3(%arg0: i32, %arg1: i32) -> (i32, i32) {
    %c0_i32 = arith.constant 0 : i32
    %c0_i32_0 = arith.constant 0 : i32
    %c0_i32_1 = arith.constant 0 : i32
    return %c0_i32, %c0_i32_0 : i32, i32
  }
  func.func @transform_4(%arg0: i32, %arg1: i32) -> (i32, i32) {
    %c0_i32 = arith.constant 0 : i32
    %c0_i32_0 = arith.constant 0 : i32
    %c0_i32_1 = arith.constant 0 : i32
    return %c0_i32, %c0_i32_0 : i32, i32
  }
  func.func @transform_5(%arg0: i32, %arg1: i32) -> (i32, i32) {
    %c0_i32 = arith.constant 0 : i32
    %c0_i32_0 = arith.constant 0 : i32
    return %arg0, %c0_i32 : i32, i32
  }
}

</mosaic_0001>

<bundles_post_ra>
// kernel: tpu_custom_call.1
= control target key start
LH: loop header
LB: loop body
LE: loop exit
PB: predicated region body
PF: predicated region fallthrough
CT: control target
= control target key end

     0   :  { %10 = vsyncpa [#allocation4], 0  ;;  %s2952_s0 = inlined_call_operand.hbm [shape: f32[8,8,16], index: 0, kind: input, shape index: {}]   ;;  %s2953_s1 = inlined_call_operand.hbm [shape: f32[16,384], index: 1, kind: input, shape index: {}]   ;;  %s2954_s2 = inlined_call_operand.hbm [shape: f32[128,384], index: 2, kind: input, shape index: {}]   ;;  %s2955_s3 = inlined_call_operand.vmem [shape: f32[1,384], index: 3, kind: input, shape index: {}]   ;;  %s2956_s4 = inlined_call_operand.vmem [shape: f32[1,128], index: 4, kind: input, shape index: {}]   ;;  %s2957_s5 = inlined_call_operand.hbm [shape: f32[8,128], index: 5, kind: output, shape index: {}]  }
   0x1   :  { %12 = vsyncpa [#allocation4 + $0x1], 0 }
   0x2   :  { %13 = vsyncpa [#allocation7], 0 }
   0x3   :  { %14 = vsyncpa [#allocation5], 0  ;;  %s2317_s18 = smov 0   ;;  %s2319_s19 = smov 0  }
   0x4   :  { %s2321_s20 = smov 0   ;;  %s2323_s21 = smov 0  }
   0x5   :  { %s2325_s22 = smov 0   ;;  %s2327_s23 = smov 0  }
   0x6 LB: > { %s1695_s24 = sadd.s32 4294967295, %s2274_s23   ;;  %p54_p0 = scmp.ne.s32.totalorder %s2258_s19, %s2254_s18  ;;  %s2274_s23 = sphi %s2327_s23, %s20_s23   ;;  %s2270_s22 = sphi %s2325_s22, %s3038_s22   ;;  %s2266_s21 = sphi %s2323_s21, %s3037_s21   ;;  %s2262_s20 = sphi %s2321_s20, %s3036_s20   ;;  %s2258_s19 = sphi %s2319_s19, %s3035_s19   ;;  %s2254_s18 = sphi %s2317_s18, %s3034_s18  }
   0x7   : > { %p2349_p1 = scmp.eq.s32.totalorder %s1695_s24, 0  ;;  %p1696_p2 = scmp.ge.s32.totalorder %s2274_s23, 1 }
   0x8   : > { %p175_p3 = scmp.lt.s32.totalorder %s2274_s23, 3  ;;  %s2276_s28 = smov [#allocation6]  }
   0x9   : > { %s2987_s25 = scalar_select %p2349_p1, 1, 0 }
   0xa   : > { %p2357_p4 = por %p2349_p1, %p54_p0  ;;  %p2361_p5 = pnand %p1696_p2, %p175_p3 }
   0xb   : > { %s187_s29 = sshll.u32 %s2276_s28, 4  ;;  %s2277_s6 = smov [#allocation8]   ;;  %s188_s29 = int_to_ptr.vmem [resolvable:$true] %s187_s29 }
   0xc   : > { %p1996_p6 = pneg %p2361_p5  ;;  %s200_s7 = sshll.u32 %s2277_s6, 4  ;;  %s201_s7 = int_to_ptr.vmem [resolvable:$true] %s200_s7 }
   0xd   : > { %s2123_s8 = scalar_lea.vmem %s188_s29, 768  ;;  %p2131_p12 = scmp.lt.s32.totalorder %s188_s29, %s188_s29 }
   0xe   : > { %p2369_p7 = pnand %p1996_p6, %p2349_p1  ;;  %p2124_p9 = scmp.ne.s32.totalorder %s188_s29, %s2123_s8 }
   0xf   : > { %p2132_p13 = scmp.lt.s32.totalorder %s2123_s8, %s2123_s8 }
  0x10   : > { %p2114_p8 = pneg %p2369_p7 }
  0x11   : > { %p2133_p0 = por %p2132_p13, %p2131_p12 }
  0x12   : > { %p2126_p10 = pnand %p2124_p9, %p2114_p8 }
  0x14   : > { %p2127_p11 = pneg %p2126_p10 }
  0x16   : > { %p2134_p2 = pnand %p2133_p0, %p2127_p11 }
  0x18   : > { %2137 = shalt.err (!%p2134_p2)
}
  0x19   : > { %s2278_s9 = smov 384   ;;  %s2279_s10 = smov 24  }
  0x1a   : > { %1999 = dma.hbm_to_vmem [thread:$0]  (!%p2369_p7), %s2953_s1, 768, %s188_s29, [#allocation7], %s2278_s9, %s2278_s9, %s2279_s10  }
  0x1b   : > { %s2149_s13 = scalar_lea.vmem %s201_s7, 6144  ;;  %p2157_p10 = scmp.lt.s32.totalorder %s201_s7, %s201_s7 }
  0x1c   : > { %p2150_p3 = scmp.ne.s32.totalorder %s201_s7, %s2149_s13  ;;  %p2158_p1 = scmp.lt.s32.totalorder %s2149_s13, %s2149_s13 }
  0x1e   : > { %p2152_p6 = pnand %p2150_p3, %p2114_p8  ;;  %p2159_p12 = por %p2158_p1, %p2157_p10 }
  0x20   : > { %p2153_p9 = pneg %p2152_p6 }
  0x22   : > { %p2160_p11 = pnand %p2159_p12, %p2153_p9 }
  0x24   : > { %2163 = shalt.err (!%p2160_p11)
}
  0x25   : > { %2002 = dma.hbm_to_vmem [thread:$0]  (!%p2369_p7), %s2954_s2, 6144, %s201_s7, [#allocation7], %s2278_s9, %s2278_s9, %s2279_s10  }
  0x26   : > { %s29_s16 = sadd.s32 1, %s2270_s22  ;;  %s41_s17 = sadd.s32 1, %s2262_s20 }
  0x27   : > { %p30_p1 = scmp.ge.s32.totalorder %s29_s16, 2  ;;  %p48_p8 = scmp.ne.s32.totalorder %s2262_s20, %s2258_s19 }
  0x28   : > { %p49_p13 = scmp.eq.s32.totalorder %s2274_s23, 0  ;;  %p2009_p0 = scmp.lt.s32.totalorder %s2274_s23, 2 }
  0x29   : > { %s3040_s16 = smov (%p30_p1, %s29_s16), 0  ;;  %s220_s18 = sand.u32 1, %s2262_s20  }
  0x2a   : > { %p50_p2 = por %p49_p13, %p48_p8  ;;  %s36_s28 = ssub.s32 %s2270_s22, %s3040_s16 }
  0x2b   : > { %p39_p3 = scmp.eq.s32.totalorder %s36_s28, 0  ;;  %s1700_s29 = sshll.u32 %s220_s18, 5 }
  0x2c   : > { %s1733_s30 = sshll.u32 %s2270_s22, 9  ;;  %s224_s10 = scalar_lea.vmem [#allocation3], %s1700_s29 }
  0x2d   : > { %s2404_s6 = scalar_select %p39_p3, %s2262_s20, %s41_s17  }
  0x2e   : > { %s231_s9 = scalar_lea.hbm %s2952_s0, %s1733_s30  ;;  %s232_s11 = sshll.u32 %s224_s10, 4  ;;  %s233_s11 = int_to_ptr.vmem [resolvable:$true] %s232_s11 }
  0x2f   : > { %p2411_p7 = pnand %p2009_p0, %p50_p2  ;;  %s221_s13 = scalar_lea.sflag [#allocation4], %s220_s18 }
  0x30   : > { %s2177_s14 = scalar_lea.vmem %s233_s11, 512  ;;  %s2280_s15 = smov [#allocation3]  }
  0x31   : > { %p2166_p6 = pneg %p2411_p7  ;;  %p2178_p9 = scmp.ne.s32.totalorder %s233_s11, %s2177_s14 }
  0x32   : > { %s2182_s17 = sshll.u32 %s2280_s15, 4  ;;  %s2183_s17 = int_to_ptr.vmem [resolvable:$false] %s2182_s17 }
  0x33   : > { %p2180_p10 = pnand %p2178_p9, %p2166_p6  ;;  %s2184_s28 = scalar_lea.vmem %s2183_s17, 1024 }
  0x34   : > { %p2185_p11 = scmp.lt.s32.totalorder %s233_s11, %s2183_s17  ;;  %p2186_p1 = scmp.lt.s32.totalorder %s2184_s28, %s2177_s14 }
  0x35   : > { %p2181_p12 = pneg %p2180_p10 }
  0x36   : > { %p2187_p8 = por %p2186_p1, %p2185_p11 }
  0x38   : > { %p2188_p13 = pnand %p2187_p8, %p2181_p12 }
  0x3a   : > { %2191 = shalt.err (!%p2188_p13)
}
  0x3b   : > { %s2281_s29 = smov 128   ;;  %s2282_s30 = smov 8  }
  0x3c   : > { %2006 = dma.hbm_to_vmem [thread:$0]  (!%p2411_p7), %s231_s9, 512, %s233_s11, %s221_s13, %s2281_s29, %s2281_s29, %s2282_s30  }
  0x3d   : > { %244 = sbr.rel (%p2361_p5) target bundleno = 1147 (0x47b), region = 40 }
  0x42   : > { %s246_s18 = sand.u32 1, %s2258_s19  }
  0x43   : > { %s1704_s8 = sshll.u32 %s246_s18, 5  ;;  %s247_s7 = scalar_lea.sflag [#allocation4], %s246_s18 }
  0x44   : > { %s2422_s10 = scalar_lea.vmem [#allocation3], %s1704_s8 }
  0x45   : > { %2241 = dma.done.wait (%p2357_p4), %s247_s7, 512  }
  0x46   : > { %2243 = vsyncadd (%p2357_p4), %s247_s7, 4294966784  ;;  %p2992_p0 = scmp.ne.s32.totalorder %s2987_s25, 0 }
  0x48   : > { %2245 = dma.done.wait (%p2992_p0), [#allocation7], 6912  }
  0x49   : > { %2247 = vsyncadd (%p2992_p0), [#allocation7], 4294960384  ;;  %p1707_p5 = scmp.ne.s32.totalorder %s2266_s21, 0 }
  0x4b   : > { %284 = sbr.rel (%p1707_p5) target bundleno = 82 (0x52), region = 56 }
  0x50   : > { %v2283_v0 = vmov 0.0  }
  0x51   : > { %285 = vst [vmem:[#allocation2] sm:$0xff] %v2283_v0 }
  0x52 PF: > { %v2433_v1 = vld [vmem:[#allocation6 + $0x20] sm:$0xff]  ;;  %v2435_v2 = vld [vmem:[#allocation6 + $0x18] sm:$0xff]  ;;  %v2437_v3 = vld [vmem:[#allocation6 + $0x8] sm:$0xff]  ;;  %v2971_v5 = vmov 0.0   ;;  %vm366_vm0 = vcmask 130048   ;;  %vm2285_vm1 = vmmov 0   ;;  %v342_v61 = vlaneseq }
  0x53   : > { %2993 = vst [vmem:[#allocation13_spill] sm:$0xff] %v2433_v1  ;;  %398 = vmatprep.subr.mxu0 %v2433_v1  ;;  %v2440_v4 = vld [vmem:[#allocation6] sm:$0xff]  ;;  %434 = vmatprep.mubr.f32.mxu0 %v2971_v5  ;;  %v2449_v8 = vld [vmem:[#allocation8 + $0x168] sm:$0xff]  ;;  %v2454_v9 = vld [vmem:[#allocation8 + $0x158] sm:$0xff]  ;;  %p1728_p4 = scmp.ne.s32.totalorder %s2266_s21, 1 }
  0x54   : > { %399 = vmatpush1.msra.mxu0 %v2435_v2  ;;  %v365_v6 = vld [vmem:[%s2422_s10] sm:$0xff]  ;;  %1814 = vmatprep.subr.mxu1 %v2971_v5  ;;  %v2461_v11 = vld [vmem:[#allocation8 + $0x140] sm:$0xff]  ;;  %v2465_v12 = vld [vmem:[#allocation8 + $0x138] sm:$0xff]  ;;  %v343_v62 = vshrl.u32 %v342_v61, 7 }
  0x55   : > { %v2445_v7 = vld [vmem:[#allocation8 + $0x170] sm:$0xff]  ;;  %400 = vmatprep.subr.mxu0 %v2437_v3  ;;  %1818 = vmatprep.mubr.msk.f32.mxu1 %vm2285_vm1, %v2971_v5  ;;  %v2468_v13 = vld [vmem:[#allocation8 + $0x128] sm:$0xff]  ;;  %v2471_v14 = vld [vmem:[#allocation8 + $0x120] sm:$0xff] }
  0x56   : > { %401 = vmatpush1.msra.mxu0 %v2440_v4  ;;  %v2458_v10 = vld [vmem:[#allocation8 + $0x150] sm:$0xff]  ;;  %v2476_v16 = vld [vmem:[#allocation6 + $0x28] sm:$0xff]  ;;  %v2479_v17 = vld [vmem:[#allocation8 + $0x108] sm:$0xff]  ;;  %v344_v63 = vsub.s32 0, %v343_v62 }
  0x57   : > { %1709 = vmatmul.mubr.msk.f32.vlgmr.msra.gmra.mxu0 %vm366_vm0, %v365_v6  ;;  %511 = vmatprep.subr.mxu0 %v2445_v7  ;;  %v2474_v15 = vld [vmem:[#allocation8 + $0x110] sm:$0xff]  ;;  %v2482_v18 = vld [vmem:[#allocation6 + $0x10] sm:$0xff]  ;;  %v2485_v19 = vld [vmem:[#allocation8 + $0xf8] sm:$0xff] }
  0x58   : > { %512 = vmatpush1.msra.mxu0 %v2449_v8  ;;  %575 = vmatprep.mubr.f32.mxu0 %v2971_v5  ;;  %v2489_v20 = vld [vmem:[#allocation8 + $0xf0] sm:$0xff]  ;;  %v2492_v21 = vld [vmem:[#allocation8 + $0x178] sm:$0xff]  ;;  %v2495_v22 = vld [vmem:[#allocation8 + $0xe0] sm:$0xff] }
  0x59   : > { %513 = vmatprep.subr.mxu0 %v2454_v9  ;;  %1815 = vmatpush3.msra.mxu1 %v2476_v16  ;;  %v2499_v23 = vld [vmem:[#allocation8 + $0xd8] sm:$0xff]  ;;  %v2502_v24 = vld [vmem:[#allocation8 + $0x160] sm:$0xff]  ;;  %v2505_v25 = vld [vmem:[#allocation8 + $0xc8] sm:$0xff] }
  0x5a   : > { %514 = vmatpush1.msra.mxu0 %v2458_v10  ;;  %1816 = vmatprep.subr.mxu1 %v2971_v5  ;;  %v2509_v26 = vld [vmem:[#allocation8 + $0xc0] sm:$0xff]  ;;  %v2512_v27 = vld [vmem:[#allocation8 + $0x148] sm:$0xff]  ;;  %v2515_v28 = vld [vmem:[#allocation8 + $0xb0] sm:$0xff] }
  0x5b   : > { %515 = vmatprep.subr.mxu0 %v2461_v11  ;;  %1817 = vmatpush3.msra.mxu1 %v2482_v18  ;;  %v2519_v29 = vld [vmem:[#allocation8 + $0xa8] sm:$0xff]  ;;  %v2522_v30 = vld [vmem:[#allocation8 + $0x130] sm:$0xff]  ;;  %v2525_v31 = vld [vmem:[#allocation8 + $0x98] sm:$0xff] }
  0x5c   : > { %516 = vmatpush1.msra.mxu0 %v2465_v12  ;;  %1821 = vmatprep.subr.mxu1 %v2971_v5  ;;  %v2529_v32 = vld [vmem:[#allocation8 + $0x90] sm:$0xff]  ;;  %v2532_v33 = vld [vmem:[#allocation8 + $0x118] sm:$0xff]  ;;  %v2535_v34 = vld [vmem:[#allocation8 + $0x80] sm:$0xff] }
  0x5d   : > { %517 = vmatprep.subr.mxu0 %v2468_v13  ;;  %1819 = vmatmul.mubr.msk.f32.vlgmr.msra.gmra.mxu1 %vm366_vm0, %v365_v6  ;;  %v2539_v35 = vld [vmem:[#allocation8 + $0x78] sm:$0xff]  ;;  %v2542_v36 = vld [vmem:[#allocation8 + $0x100] sm:$0xff]  ;;  %v2545_v37 = vld [vmem:[#allocation8 + $0x68] sm:$0xff] }
  0x5e   : > { %518 = vmatpush1.msra.mxu0 %v2471_v14  ;;  %1822 = vmatpush3.msra.mxu1 %v2492_v21  ;;  %v2549_v38 = vld [vmem:[#allocation8 + $0x60] sm:$0xff]  ;;  %v2552_v39 = vld [vmem:[#allocation8 + $0xe8] sm:$0xff]  ;;  %v2555_v40 = vld [vmem:[#allocation8 + $0x50] sm:$0xff] }
  0x5f   : > { %519 = vmatprep.subr.mxu0 %v2474_v15  ;;  %1823 = vmatprep.subr.mxu1 %v2971_v5  ;;  %2994 = vst [vmem:[#allocation14_spill] sm:$0xff] %v2555_v40  ;;  %v2559_v41 = vld [vmem:[#allocation8 + $0x48] sm:$0xff]  ;;  %v2562_v42 = vld [vmem:[#allocation8 + $0xd0] sm:$0xff]  ;;  %v2565_v43 = vld [vmem:[#allocation8 + $0x38] sm:$0xff] }
  0x60   : > { %520 = vmatpush1.msra.mxu0 %v2479_v17  ;;  %1824 = vmatpush3.msra.mxu1 %v2502_v24  ;;  %2995 = vst [vmem:[#allocation15_spill] sm:$0xff] %v2559_v41  ;;  %2996 = vst [vmem:[#allocation16_spill] sm:$0xff] %v2565_v43  ;;  %v2569_v44 = vld [vmem:[#allocation8 + $0x30] sm:$0xff]  ;;  %v2572_v45 = vld [vmem:[#allocation8 + $0xb8] sm:$0xff] }
  0x61   : > { %521 = vmatprep.subr.mxu0 %v2485_v19  ;;  %1825 = vmatprep.subr.mxu1 %v2971_v5  ;;  %2997 = vst [vmem:[#allocation17_spill] sm:$0xff] %v2569_v44  ;;  %v2575_v46 = vld [vmem:[#allocation8 + $0x20] sm:$0xff]  ;;  %v2579_v47 = vld [vmem:[#allocation8 + $0x18] sm:$0xff]  ;;  %v2585_v49 = vld [vmem:[#allocation8 + $0x8] sm:$0xff] }
  0x62   : > { %522 = vmatpush1.msra.mxu0 %v2489_v20  ;;  %1826 = vmatpush3.msra.mxu1 %v2512_v27  ;;  %2998 = vst [vmem:[#allocation18_spill] sm:$0xff] %v2575_v46  ;;  %2999 = vst [vmem:[#allocation19_spill] sm:$0xff] %v2579_v47  ;;  %v2582_v48 = vld [vmem:[#allocation8 + $0xa0] sm:$0xff]  ;;  %v2592_v51 = vld [vmem:[#allocation8 + $0x88] sm:$0xff] }
  0x63   : > { %523 = vmatprep.subr.mxu0 %v2495_v22  ;;  %1827 = vmatprep.subr.mxu1 %v2971_v5  ;;  %3000 = vst [vmem:[#allocation20_spill] sm:$0xff] %v2585_v49  ;;  %v2589_v50 = vld [vmem:[#allocation8] sm:$0xff]  ;;  %v2595_v52 = vld [vmem:[#allocation2] sm:$0xff]  ;;  %v2600_v53 = vld [vmem:[#allocation8 + $0x70] sm:$0xff] }
  0x64   : > { %524 = vmatpush1.msra.mxu0 %v2499_v23  ;;  %1828 = vmatpush3.msra.mxu1 %v2522_v30  ;;  %3001 = vst [vmem:[#allocation21_spill] sm:$0xff] %v2589_v50  ;;  %3002 = vst [vmem:[#allocation22_spill] sm:$0xff] %v2600_v53  ;;  %v2606_v54 = vld [vmem:[#allocation8 + $0x58] sm:$0xff]  ;;  %v2612_v55 = vld [vmem:[#allocation8 + $0x40] sm:$0xff] }
  0x65   : > { %525 = vmatprep.subr.mxu0 %v2505_v25  ;;  %1829 = vmatprep.subr.mxu1 %v2971_v5  ;;  %3003 = vst [vmem:[#allocation23_spill] sm:$0xff] %v2606_v54  ;;  %3004 = vst [vmem:[#allocation24_spill] sm:$0xff] %v2612_v55  ;;  %v2618_v56 = vld [vmem:[#allocation8 + $0x28] sm:$0xff]  ;;  %v2624_v57 = vld [vmem:[#allocation8 + $0x10] sm:$0xff] }
  0x66   : > { %526 = vmatpush1.msra.mxu0 %v2509_v26  ;;  %1830 = vmatpush3.msra.mxu1 %v2532_v33  ;;  %3005 = vst [vmem:[#allocation25_spill] sm:$0xff] %v2618_v56  ;;  %3006 = vst [vmem:[#allocation26_spill] sm:$0xff] %v2624_v57  ;;  %v1713_v58 = vld [vmem:[%s2422_s10 + $0x8] sm:$0xff]  ;;  %v340_v0 = vld [vmem:[%s2955_s3] sm:$0x7] }
  0x67   : > { %527 = vmatprep.subr.mxu0 %v2515_v28  ;;  %1831 = vmatprep.subr.mxu1 %v2971_v5 }
  0x68   : > { %528 = vmatpush1.msra.mxu0 %v2519_v29  ;;  %1832 = vmatpush3.msra.mxu1 %v2542_v36 }
  0x69   : > { %529 = vmatprep.subr.mxu0 %v2525_v31  ;;  %1833 = vmatprep.subr.mxu1 %v2971_v5 }
  0x6a   : > { %530 = vmatpush1.msra.mxu0 %v2529_v32  ;;  %1834 = vmatpush3.msra.mxu1 %v2552_v39 }
  0x6b   : > { %531 = vmatprep.subr.mxu0 %v2535_v34  ;;  %1835 = vmatprep.subr.mxu1 %v2971_v5 }
  0x6c   : > { %532 = vmatpush1.msra.mxu0 %v2539_v35  ;;  %1836 = vmatpush3.msra.mxu1 %v2562_v42 }
  0x6d   : > { %533 = vmatprep.subr.mxu0 %v2545_v37  ;;  %1837 = vmatprep.subr.mxu1 %v2971_v5 }
  0x6e   : > { %534 = vmatpush1.msra.mxu0 %v2549_v38  ;;  %1838 = vmatpush3.msra.mxu1 %v2572_v45 }
  0x6f   : > { %535 = vmatprep.subr.mxu0 %v2555_v40  ;;  %1839 = vmatprep.subr.mxu1 %v2971_v5 }
  0x70   : > { %536 = vmatpush1.msra.mxu0 %v2559_v41  ;;  %1840 = vmatpush3.msra.mxu1 %v2582_v48 }
  0x71   : > { %537 = vmatprep.subr.mxu0 %v2565_v43  ;;  %1841 = vmatprep.subr.mxu1 %v2971_v5 }
  0x72   : > { %538 = vmatpush1.msra.mxu0 %v2569_v44  ;;  %1842 = vmatpush3.msra.mxu1 %v2592_v51 }
  0x73   : > { %539 = vmatprep.subr.mxu0 %v2575_v46  ;;  %1843 = vmatprep.subr.mxu1 %v2971_v5 }
  0x74   : > { %540 = vmatpush1.msra.mxu0 %v2579_v47  ;;  %1844 = vmatpush3.msra.mxu1 %v2600_v53 }
  0x75   : > { %541 = vmatprep.subr.mxu0 %v2585_v49  ;;  %1853 = vmatprep.mubr.msk.f32.mxu1 %vm2285_vm1, %v2971_v5 }
  0x76   : > { %542 = vmatpush1.msra.mxu0 %v2589_v50  ;;  %1845 = vmatprep.subr.mxu1 %v2971_v5 }
  0x77   : > { %576 = vmatmul.mubr.f32.vlgmr.msra.gmra.mxu0 %v2595_v52  ;;  %706 = vmatprep.subr.mxu0 %v2433_v1 }
  0x78   : > { %1846 = vmatpush3.msra.mxu1 %v2606_v54  ;;  %707 = vmatpush1.msra.mxu0 %v2435_v2 }
  0x79   : > { %1847 = vmatprep.subr.mxu1 %v2971_v5  ;;  %708 = vmatprep.subr.mxu0 %v2437_v3 }
  0x7a   : > { %1848 = vmatpush3.msra.mxu1 %v2612_v55  ;;  %709 = vmatpush1.msra.mxu0 %v2440_v4 }
  0x7b   : > { %1849 = vmatprep.subr.mxu1 %v2971_v5  ;;  %742 = vmatprep.mubr.f32.mxu0 %v2971_v5 }
  0x7c   : > { %1850 = vmatpush3.msra.mxu1 %v2618_v56  ;;  %819 = vmatprep.subr.mxu0 %v2445_v7 }
  0x7d   : > { %1851 = vmatprep.subr.mxu1 %v2971_v5  ;;  %1714 = vmatmul.mubr.msk.f32.vlgmr.msra.gmra.mxu0 %vm366_vm0, %v1713_v58 }
  0x7e   : > { %1852 = vmatpush3.msra.mxu1 %v2624_v57  ;;  %820 = vmatpush1.msra.mxu0 %v2449_v8 }
  0x7f   : > { %1854 = vmatmul.mubr.f32.vlgmr.msra.gmra.mxu1 %v2595_v52  ;;  %1856 = vmatprep.subr.mxu1 %v2971_v5 }
  0x80   : > { %1857 = vmatpush3.msra.mxu1 %v2476_v16  ;;  %1860 = vmatprep.mubr.msk.f32.mxu1 %vm2285_vm1, %v2971_v5 }
  0x81   : > { %1858 = vmatprep.subr.mxu1 %v2971_v5  ;;  %821 = vmatprep.subr.mxu0 %v2454_v9 }
  0x82   : > { %1859 = vmatpush3.msra.mxu1 %v2482_v18  ;;  %822 = vmatpush1.msra.mxu0 %v2458_v10 }
  0x83   : > { %1863 = vmatprep.subr.mxu1 %v2971_v5  ;;  %1861 = vmatmul.mubr.msk.f32.vlgmr.msra.gmra.mxu1 %vm366_vm0, %v1713_v58  ;;  %v2712_v58 = vrot.slane %v340_v0, %v344_v63 }
  0x84   : > { %1864 = vmatpush3.msra.mxu1 %v2492_v21  ;;  %823 = vmatprep.subr.mxu0 %v2461_v11 }
  0x85   : > { %1865 = vmatprep.subr.mxu1 %v2971_v5  ;;  %824 = vmatpush1.msra.mxu0 %v2465_v12 }
  0x86   : > { %1866 = vmatpush3.msra.mxu1 %v2502_v24  ;;  %825 = vmatprep.subr.mxu0 %v2468_v13 }
  0x87   : > { %1867 = vmatprep.subr.mxu1 %v2971_v5  ;;  %826 = vmatpush1.msra.mxu0 %v2471_v14 }
  0x88   : > { %1868 = vmatpush3.msra.mxu1 %v2512_v27  ;;  %827 = vmatprep.subr.mxu0 %v2474_v15 }
  0x89   : > { %1869 = vmatprep.subr.mxu1 %v2971_v5  ;;  %828 = vmatpush1.msra.mxu0 %v2479_v17 }
  0x8a   : > { %1870 = vmatpush3.msra.mxu1 %v2522_v30  ;;  %829 = vmatprep.subr.mxu0 %v2485_v19 }
  0x8b   : > { %1871 = vmatprep.subr.mxu1 %v2971_v5  ;;  %830 = vmatpush1.msra.mxu0 %v2489_v20 }
  0x8c   : > { %1872 = vmatpush3.msra.mxu1 %v2532_v33  ;;  %831 = vmatprep.subr.mxu0 %v2495_v22 }
  0x8d   : > { %1873 = vmatprep.subr.mxu1 %v2971_v5  ;;  %832 = vmatpush1.msra.mxu0 %v2499_v23 }
  0x8e   : > { %1874 = vmatpush3.msra.mxu1 %v2542_v36  ;;  %833 = vmatprep.subr.mxu0 %v2505_v25 }
  0x8f   : > { %1875 = vmatprep.subr.mxu1 %v2971_v5  ;;  %834 = vmatpush1.msra.mxu0 %v2509_v26 }
  0x90   : > { %1876 = vmatpush3.msra.mxu1 %v2552_v39  ;;  %835 = vmatprep.subr.mxu0 %v2515_v28 }
  0x91   : > { %1877 = vmatprep.subr.mxu1 %v2971_v5  ;;  %836 = vmatpush1.msra.mxu0 %v2519_v29 }
  0x92   : > { %1878 = vmatpush3.msra.mxu1 %v2562_v42  ;;  %837 = vmatprep.subr.mxu0 %v2525_v31 }
  0x93   : > { %1879 = vmatprep.subr.mxu1 %v2971_v5  ;;  %838 = vmatpush1.msra.mxu0 %v2529_v32 }
  0x94   : > { %1880 = vmatpush3.msra.mxu1 %v2572_v45  ;;  %839 = vmatprep.subr.mxu0 %v2535_v34 }
  0x95   : > { %1881 = vmatprep.subr.mxu1 %v2971_v5  ;;  %840 = vmatpush1.msra.mxu0 %v2539_v35 }
  0x96   : > { %1882 = vmatpush3.msra.mxu1 %v2582_v48  ;;  %841 = vmatprep.subr.mxu0 %v2545_v37 }
  0x97   : > { %1883 = vmatprep.subr.mxu1 %v2971_v5  ;;  %842 = vmatpush1.msra.mxu0 %v2549_v38 }
  0x98   : > { %1884 = vmatpush3.msra.mxu1 %v2592_v51  ;;  %843 = vmatprep.subr.mxu0 %v2555_v40 }
  0x99   : > { %1885 = vmatprep.subr.mxu1 %v2971_v5  ;;  %844 = vmatpush1.msra.mxu0 %v2559_v41  ;;  %v352_v41 = vsub.s32 2, %v343_v62 }
  0x9a   : > { %1886 = vmatpush3.msra.mxu1 %v2600_v53  ;;  %845 = vmatprep.subr.mxu0 %v2565_v43 }
  0x9b   : > { %1887 = vmatprep.subr.mxu1 %v2971_v5  ;;  %846 = vmatpush1.msra.mxu0 %v2569_v44 }
  0x9c   : > { %1888 = vmatpush3.msra.mxu1 %v2606_v54  ;;  %847 = vmatprep.subr.mxu0 %v2575_v46 }
  0x9d   : > { %1889 = vmatprep.subr.mxu1 %v2971_v5  ;;  %848 = vmatpush1.msra.mxu0 %v2579_v47 }
  0x9e   : > { %1890 = vmatpush3.msra.mxu1 %v2612_v55  ;;  %849 = vmatprep.subr.mxu0 %v2585_v49 }
  0x9f   : > { %1891 = vmatprep.subr.mxu1 %v2971_v5  ;;  %850 = vmatpush1.msra.mxu0 %v2589_v50 }
  0xa0   : > { %1892 = vmatpush3.msra.mxu1 %v2618_v56  ;;  %883 = vmatprep.mubr.f32.mxu0 %v2971_v5 }
  0xa1   : > { %1893 = vmatprep.subr.mxu1 %v2971_v5  ;;  %1895 = vmatprep.mubr.msk.f32.mxu1 %vm2285_vm1, %v2971_v5 }
  0xa2   : > { %1894 = vmatpush3.msra.mxu1 %v2624_v57  ;;  %1014 = vmatprep.subr.mxu0 %v2433_v1  ;;  %v348_v1 = vsub.s32 1, %v343_v62 }
  0xa3   : > { %1898 = vmatprep.subr.mxu1 %v2971_v5 }
  0xa4   : > { %v2715_v5 = vrot.slane %v340_v0, %v348_v1 }
 0x117   : > { %v436_v6 = vpop.f32.mrf.mxu0 }
 0x118   : > { %v437_v50 = vadd.f32 %v436_v6, %v2712_v58 }
 0x119   : > { %v438_v57 = vpop.f32.mrf.mxu0 }
 0x11a   : > { %v439_v61 = vadd.f32 %v438_v57, %v2715_v5 }
 0x11d   : > { %v507_v59 = vpop.f32.mrf.mxu1 }
 0x11f   : > { %v1820_v60 = vpop.f32.mrf.mxu1 }
 0x137   : > { %v577_v49 = vpop.f32.mrf.mxu0 }
 0x138   : > { %v652_v56 = vadd.f32 %v577_v49, %v437_v50  ;;  %v2721_v49 = vld [vmem:[%s2956_s4] ss:$0 sm:$0xff] }
 0x139   : > { %v579_v60 = vpop.f32.mrf.mxu0 }
 0x13a   : > { %v1711_v47 = vmul.f32 -1.442695, %v652_v56  ;;  %v659_v55 = vadd.f32 %v579_v60, %v439_v61 }
 0x13c   : > { %2072 = vpow2.f32 %v1711_v47  ;;  %v1712_v43 = vmul.f32 -1.442695, %v659_v55  ;;  %v2723_v47 = vrot.slane %v340_v0, %v352_v41  ;;  %v3007_v41 = vmov 0.0   ;;  %v3008_v0 = vld [vmem:[#allocation15_spill] sm:$0xff] }
 0x13e   : > { %2074 = vpow2.f32 %v1712_v43  ;;  %v508_v57 = vadd.f32 %v507_v59, %v2723_v47  ;;  %v1718_v59 = vld [vmem:[%s2422_s10 + $0x10] sm:$0xff] }
 0x13f   : > { %v648_v46 = vpop.f32.mrf.mxu1 }
 0x140   : > { %v666_v1 = vadd.f32 %v2721_v49, %v648_v46 }
 0x141   : > { %v1855_v44 = vpop.f32.mrf.mxu1 }
 0x143   : > { %v2743_v46 = vpop.f32.mrf.mxu1 }
 0x149   : > { %v2073_v54 = vpop.eup %2072 }
 0x14a   : > { %v656_v63 = vadd.f32 1.0, %v2073_v54 }
 0x14b   : > { %v2075_v50 = vpop.eup %2074 }
 0x14c   : > { %2076 = vrcp.f32 %v656_v63  ;;  %v663_v55 = vadd.f32 1.0, %v2075_v50  ;;  %v3009_v63 = vld [vmem:[#allocation23_spill] sm:$0xff]  ;;  %v3011_v50 = vld [vmem:[#allocation17_spill] sm:$0xff] }
 0x159   : > { %v2077_v56 = vpop.eup %2076 }
 0x15a   : > { %v667_v44 = vmul.f32 %v2077_v56, %v666_v1  ;;  %v3010_v1 = vld [vmem:[#allocation16_spill] sm:$0xff] }
 0x15b   : > { %v3012_v56 = vld [vmem:[#allocation24_spill] sm:$0xff] }
 0x15c   : > { %v668_v6 = vadd.f32 %v667_v44, %v508_v57  ;;  %v3013_v57 = vld [vmem:[#allocation18_spill] sm:$0xff]  ;;  %v3014_v44 = vld [vmem:[#allocation19_spill] sm:$0xff] }
 0x15e   : > { %2078 = vtanh.f32 %v668_v6  ;;  %v3016_v6 = vld [vmem:[#allocation20_spill] sm:$0xff] }
 0x15f   : > { %2080 = vrcp.f32 %v663_v55  ;;  %v3015_v55 = vld [vmem:[#allocation25_spill] sm:$0xff] }
 0x16b   : > { %v2079_v43 = vpop.eup %2078 }
 0x16c   : > { %v670_v54 = vsub.f32 %v2595_v52, %v2079_v43  ;;  %v2081_v62 = vpop.eup %2080  ;;  %v1862_v52 = vpop.f32.mrf.mxu1 }
 0x16e   : > { %v671_v60 = vmul.f32 %v2081_v62, %v670_v54  ;;  %v3018_v54 = vld [vmem:[#allocation26_spill] sm:$0xff]  ;;  %v3019_v62 = vld [vmem:[#allocation13_spill] sm:$0xff] }
 0x170   : > { %v2728_v61 = vadd.f32 %v2079_v43, %v671_v60  ;;  %v3017_v43 = vld [vmem:[#allocation21_spill] sm:$0xff]  ;;  %v744_v60 = vpop.f32.mrf.mxu0 }
 0x172   : > { %884 = vmatmul.mubr.f32.vlgmr.msra.gmra.mxu0 %v2728_v61  ;;  %1896 = vmatmul.mubr.f32.vlgmr.msra.gmra.mxu1 %v2728_v61  ;;  %v746_v52 = vpop.f32.mrf.mxu0 }
 0x173   : > { %1015 = vmatpush1.msra.mxu0 %v2435_v2  ;;  %1899 = vmatpush3.msra.mxu1 %v2476_v16 }
 0x174   : > { %1016 = vmatprep.subr.mxu0 %v2437_v3  ;;  %1050 = vmatprep.mubr.f32.mxu0 %v3007_v41 }
 0x175   : > { %1017 = vmatpush1.msra.mxu0 %v2440_v4  ;;  %1900 = vmatprep.subr.mxu1 %v3007_v41 }
 0x176   : > { %1901 = vmatpush3.msra.mxu1 %v2482_v18  ;;  %1902 = vmatprep.mubr.msk.f32.mxu1 %vm2285_vm1, %v3007_v41 }
 0x177   : > { %1127 = vmatprep.subr.mxu0 %v2445_v7  ;;  %1905 = vmatprep.subr.mxu1 %v3007_v41 }
 0x178   : > { %1719 = vmatmul.mubr.msk.f32.vlgmr.msra.gmra.mxu0 %vm366_vm0, %v1718_v59  ;;  %1903 = vmatmul.mubr.msk.f32.vlgmr.msra.gmra.mxu1 %vm366_vm0, %v1718_v59  ;;  %v745_v59 = vadd.f32 %v744_v60, %v2712_v58  ;;  %v816_v60 = vadd.f32 %v2743_v46, %v2723_v47 }
 0x179   : > { %1128 = vmatpush1.msra.mxu0 %v2449_v8  ;;  %1906 = vmatpush3.msra.mxu1 %v2492_v21 }
 0x17a   : > { %1129 = vmatprep.subr.mxu0 %v2454_v9  ;;  %1907 = vmatprep.subr.mxu1 %v3007_v41 }
 0x17b   : > { %1130 = vmatpush1.msra.mxu0 %v2458_v10  ;;  %1908 = vmatpush3.msra.mxu1 %v2502_v24 }
 0x17c   : > { %1131 = vmatprep.subr.mxu0 %v2461_v11  ;;  %1909 = vmatprep.subr.mxu1 %v3007_v41 }
 0x17d   : > { %1132 = vmatpush1.msra.mxu0 %v2465_v12  ;;  %1910 = vmatpush3.msra.mxu1 %v2512_v27 }
 0x17e   : > { %1133 = vmatprep.subr.mxu0 %v2468_v13  ;;  %1911 = vmatprep.subr.mxu1 %v3007_v41 }
 0x17f   : > { %1134 = vmatpush1.msra.mxu0 %v2471_v14  ;;  %1912 = vmatpush3.msra.mxu1 %v2522_v30 }
 0x180   : > { %1135 = vmatprep.subr.mxu0 %v2474_v15  ;;  %1913 = vmatprep.subr.mxu1 %v3007_v41 }
 0x181   : > { %1136 = vmatpush1.msra.mxu0 %v2479_v17  ;;  %1914 = vmatpush3.msra.mxu1 %v2532_v33 }
 0x182   : > { %1137 = vmatprep.subr.mxu0 %v2485_v19  ;;  %1915 = vmatprep.subr.mxu1 %v3007_v41 }
 0x183   : > { %1138 = vmatpush1.msra.mxu0 %v2489_v20  ;;  %1916 = vmatpush3.msra.mxu1 %v2542_v36 }
 0x184   : > { %1139 = vmatprep.subr.mxu0 %v2495_v22  ;;  %1917 = vmatprep.subr.mxu1 %v3007_v41 }
 0x185   : > { %1140 = vmatpush1.msra.mxu0 %v2499_v23  ;;  %1918 = vmatpush3.msra.mxu1 %v2552_v39 }
 0x186   : > { %1141 = vmatprep.subr.mxu0 %v2505_v25  ;;  %1919 = vmatprep.subr.mxu1 %v3007_v41 }
 0x187   : > { %1142 = vmatpush1.msra.mxu0 %v2509_v26  ;;  %1920 = vmatpush3.msra.mxu1 %v2562_v42 }
 0x188   : > { %1143 = vmatprep.subr.mxu0 %v2515_v28  ;;  %1921 = vmatprep.subr.mxu1 %v3007_v41 }
 0x189   : > { %1144 = vmatpush1.msra.mxu0 %v2519_v29  ;;  %1922 = vmatpush3.msra.mxu1 %v2572_v45 }
 0x18a   : > { %1145 = vmatprep.subr.mxu0 %v2525_v31  ;;  %1923 = vmatprep.subr.mxu1 %v3007_v41 }
 0x18b   : > { %1146 = vmatpush1.msra.mxu0 %v2529_v32  ;;  %1924 = vmatpush3.msra.mxu1 %v2582_v48 }
 0x18c   : > { %1147 = vmatprep.subr.mxu0 %v2535_v34  ;;  %1925 = vmatprep.subr.mxu1 %v3007_v41 }
 0x18d   : > { %1148 = vmatpush1.msra.mxu0 %v2539_v35  ;;  %1926 = vmatpush3.msra.mxu1 %v2592_v51 }
 0x18e   : > { %1149 = vmatprep.subr.mxu0 %v2545_v37  ;;  %1927 = vmatprep.subr.mxu1 %v3007_v41 }
 0x18f   : > { %1150 = vmatpush1.msra.mxu0 %v2549_v38  ;;  %1928 = vmatpush3.msra.mxu1 %v2600_v53 }
 0x190   : > { %1151 = vmatprep.subr.mxu0 %v2555_v40  ;;  %1929 = vmatprep.subr.mxu1 %v3007_v41 }
 0x191   : > { %1152 = vmatpush1.msra.mxu0 %v3008_v0  ;;  %1930 = vmatpush3.msra.mxu1 %v3009_v63 }
 0x192   : > { %1153 = vmatprep.subr.mxu0 %v3010_v1  ;;  %1931 = vmatprep.subr.mxu1 %v3007_v41 }
 0x193   : > { %1154 = vmatpush1.msra.mxu0 %v3011_v50  ;;  %1932 = vmatpush3.msra.mxu1 %v3012_v56 }
 0x194   : > { %1155 = vmatprep.subr.mxu0 %v3013_v57  ;;  %1933 = vmatprep.subr.mxu1 %v3007_v41 }
 0x195   : > { %1156 = vmatpush1.msra.mxu0 %v3014_v44  ;;  %1934 = vmatpush3.msra.mxu1 %v3015_v55 }
 0x196   : > { %1157 = vmatprep.subr.mxu0 %v3016_v6  ;;  %1935 = vmatprep.subr.mxu1 %v3007_v41 }
 0x197   : > { %1158 = vmatpush1.msra.mxu0 %v3017_v43  ;;  %1191 = vmatprep.mubr.f32.mxu0 %v3007_v41 }
 0x198   : > { %1936 = vmatpush3.msra.mxu1 %v3018_v54  ;;  %1937 = vmatprep.mubr.msk.f32.mxu1 %vm2285_vm1, %v3007_v41  ;;  %v747_v54 = vadd.f32 %v746_v52, %v2715_v5 }
 0x199   : > { %1322 = vmatprep.subr.mxu0 %v3019_v62  ;;  %1940 = vmatprep.subr.mxu1 %v3007_v41 }
 0x232   : > { %v885_v6 = vpop.f32.mrf.mxu0  ;;  %v956_v55 = vpop.f32.mrf.mxu1 }
 0x233   : > { %v960_v44 = vadd.f32 %v885_v6, %v745_v59  ;;  %v974_v40 = vadd.f32 %v2721_v49, %v956_v55 }
 0x234   : > { %v1897_v57 = vpop.f32.mrf.mxu1  ;;  %v887_v56 = vpop.f32.mrf.mxu0 }
 0x235   : > { %v1716_v43 = vmul.f32 -1.442695, %v960_v44  ;;  %v967_v50 = vadd.f32 %v887_v56, %v747_v54 }
 0x237   : > { %2082 = vpow2.f32 %v1716_v43  ;;  %v1717_v1 = vmul.f32 -1.442695, %v967_v50 }
 0x239   : > { %2084 = vpow2.f32 %v1717_v1 }
 0x244   : > { %v2083_v63 = vpop.eup %2082 }
 0x245   : > { %v964_v0 = vadd.f32 1.0, %v2083_v63 }
 0x246   : > { %v2085_v62 = vpop.eup %2084 }
 0x247   : > { %2086 = vrcp.f32 %v964_v0  ;;  %v971_v44 = vadd.f32 1.0, %v2085_v62 }
 0x254   : > { %v2087_v53 = vpop.eup %2086 }
 0x255   : > { %v975_v6 = vmul.f32 %v2087_v53, %v974_v40  ;;  %v1723_v40 = vld [vmem:[%s2422_s10 + $0x18] sm:$0xff] }
 0x257   : > { %v976_v57 = vadd.f32 %v975_v6, %v816_v60 }
 0x259   : > { %2088 = vtanh.f32 %v976_v57 }
 0x25a   : > { %2090 = vrcp.f32 %v971_v44 }
 0x266   : > { %v2089_v43 = vpop.eup %2088 }
 0x267   : > { %v978_v56 = vsub.f32 %v2728_v61, %v2089_v43  ;;  %v2091_v50 = vpop.eup %2090 }
 0x269   : > { %v979_v54 = vmul.f32 %v2091_v50, %v978_v56 }
 0x26b   : > { %v2821_v63 = vadd.f32 %v2089_v43, %v979_v54 }
 0x26d   : > { %1192 = vmatmul.mubr.f32.vlgmr.msra.gmra.mxu0 %v2821_v63  ;;  %1938 = vmatmul.mubr.f32.vlgmr.msra.gmra.mxu1 %v2821_v63 }
 0x26e   : > { %1323 = vmatpush1.msra.mxu0 %v2435_v2  ;;  %1941 = vmatpush3.msra.mxu1 %v2476_v16  ;;  %v2836_v2 = vpop.f32.mrf.mxu1 }
 0x26f   : > { %1324 = vmatprep.subr.mxu0 %v2437_v3  ;;  %1358 = vmatprep.mubr.f32.mxu0 %v3007_v41  ;;  %v3020_v3 = vld [vmem:[#allocation22_spill] sm:$0xff] }
 0x270   : > { %1325 = vmatpush1.msra.mxu0 %v2440_v4  ;;  %1942 = vmatprep.subr.mxu1 %v3007_v41  ;;  %v1904_v16 = vpop.f32.mrf.mxu1  ;;  %v3021_v4 = vld [vmem:[#allocation14_spill] sm:$0xff] }
 0x271   : > { %1943 = vmatpush3.msra.mxu1 %v2482_v18  ;;  %1944 = vmatprep.mubr.msk.f32.mxu1 %vm2285_vm1, %v3007_v41  ;;  %v3032_v18 = vld [vmem:[#allocation26_spill] sm:$0xff] }
 0x272   : > { %1435 = vmatprep.subr.mxu0 %v2445_v7  ;;  %1947 = vmatprep.subr.mxu1 %v3007_v41  ;;  %v3022_v7 = vld [vmem:[#allocation15_spill] sm:$0xff] }
 0x273   : > { %1724 = vmatmul.mubr.msk.f32.vlgmr.msra.gmra.mxu0 %vm366_vm0, %v1723_v40  ;;  %1945 = vmatmul.mubr.msk.f32.vlgmr.msra.gmra.mxu1 %vm366_vm0, %v1723_v40 }
 0x274   : > { %1436 = vmatpush1.msra.mxu0 %v2449_v8  ;;  %1948 = vmatpush3.msra.mxu1 %v2492_v21  ;;  %v3023_v8 = vld [vmem:[#allocation23_spill] sm:$0xff] }
 0x275   : > { %1437 = vmatprep.subr.mxu0 %v2454_v9  ;;  %1949 = vmatprep.subr.mxu1 %v3007_v41  ;;  %v3024_v9 = vld [vmem:[#allocation16_spill] sm:$0xff] }
 0x276   : > { %1438 = vmatpush1.msra.mxu0 %v2458_v10  ;;  %1950 = vmatpush3.msra.mxu1 %v2502_v24  ;;  %v3025_v10 = vld [vmem:[#allocation17_spill] sm:$0xff] }
 0x277   : > { %1439 = vmatprep.subr.mxu0 %v2461_v11  ;;  %1951 = vmatprep.subr.mxu1 %v3007_v41  ;;  %v3026_v11 = vld [vmem:[#allocation24_spill] sm:$0xff] }
 0x278   : > { %1440 = vmatpush1.msra.mxu0 %v2465_v12  ;;  %1952 = vmatpush3.msra.mxu1 %v2512_v27  ;;  %v3027_v12 = vld [vmem:[#allocation18_spill] sm:$0xff] }
 0x279   : > { %1441 = vmatprep.subr.mxu0 %v2468_v13  ;;  %1953 = vmatprep.subr.mxu1 %v3007_v41  ;;  %v3028_v13 = vld [vmem:[#allocation19_spill] sm:$0xff] }
 0x27a   : > { %1442 = vmatpush1.msra.mxu0 %v2471_v14  ;;  %1954 = vmatpush3.msra.mxu1 %v2522_v30  ;;  %v3029_v14 = vld [vmem:[#allocation25_spill] sm:$0xff] }
 0x27b   : > { %1443 = vmatprep.subr.mxu0 %v2474_v15  ;;  %1955 = vmatprep.subr.mxu1 %v3007_v41  ;;  %v3030_v15 = vld [vmem:[#allocation20_spill] sm:$0xff] }
 0x27c   : > { %1444 = vmatpush1.msra.mxu0 %v2479_v17  ;;  %1956 = vmatpush3.msra.mxu1 %v2532_v33  ;;  %v3031_v17 = vld [vmem:[#allocation21_spill] sm:$0xff] }
 0x27d   : > { %1445 = vmatprep.subr.mxu0 %v2485_v19  ;;  %1957 = vmatprep.subr.mxu1 %v3007_v41  ;;  %v1052_v19 = vpop.f32.mrf.mxu0 }
 0x27e   : > { %1446 = vmatpush1.msra.mxu0 %v2489_v20  ;;  %1958 = vmatpush3.msra.mxu1 %v2542_v36  ;;  %v1053_v21 = vadd.f32 %v1052_v19, %v2712_v58  ;;  %v1124_v36 = vadd.f32 %v2836_v2, %v2723_v47 }
 0x27f   : > { %1447 = vmatprep.subr.mxu0 %v2495_v22  ;;  %1959 = vmatprep.subr.mxu1 %v3007_v41  ;;  %v1054_v20 = vpop.f32.mrf.mxu0 }
 0x280   : > { %1448 = vmatpush1.msra.mxu0 %v2499_v23  ;;  %1960 = vmatpush3.msra.mxu1 %v2552_v39 }
 0x281   : > { %1449 = vmatprep.subr.mxu0 %v2505_v25  ;;  %1961 = vmatprep.subr.mxu1 %v3007_v41 }
 0x282   : > { %1450 = vmatpush1.msra.mxu0 %v2509_v26  ;;  %1962 = vmatpush3.msra.mxu1 %v2562_v42 }
 0x283   : > { %1451 = vmatprep.subr.mxu0 %v2515_v28  ;;  %1963 = vmatprep.subr.mxu1 %v3007_v41  ;;  %v1055_v28 = vadd.f32 %v1054_v20, %v2715_v5 }
 0x284   : > { %1452 = vmatpush1.msra.mxu0 %v2519_v29  ;;  %1964 = vmatpush3.msra.mxu1 %v2572_v45 }
 0x285   : > { %1453 = vmatprep.subr.mxu0 %v2525_v31  ;;  %1965 = vmatprep.subr.mxu1 %v3007_v41 }
 0x286   : > { %1454 = vmatpush1.msra.mxu0 %v2529_v32  ;;  %1966 = vmatpush3.msra.mxu1 %v2582_v48 }
 0x287   : > { %1455 = vmatprep.subr.mxu0 %v2535_v34  ;;  %1967 = vmatprep.subr.mxu1 %v3007_v41 }
 0x288   : > { %1456 = vmatpush1.msra.mxu0 %v2539_v35  ;;  %1968 = vmatpush3.msra.mxu1 %v2592_v51 }
 0x289   : > { %1457 = vmatprep.subr.mxu0 %v2545_v37  ;;  %1969 = vmatprep.subr.mxu1 %v3007_v41 }
 0x28a   : > { %1458 = vmatpush1.msra.mxu0 %v2549_v38  ;;  %1970 = vmatpush3.msra.mxu1 %v3020_v3 }
 0x28b   : > { %1459 = vmatprep.subr.mxu0 %v3021_v4  ;;  %1971 = vmatprep.subr.mxu1 %v3007_v41 }
 0x28c   : > { %1460 = vmatpush1.msra.mxu0 %v3022_v7  ;;  %1972 = vmatpush3.msra.mxu1 %v3023_v8 }
 0x28d   : > { %1461 = vmatprep.subr.mxu0 %v3024_v9  ;;  %1973 = vmatprep.subr.mxu1 %v3007_v41 }
 0x28e   : > { %1462 = vmatpush1.msra.mxu0 %v3025_v10  ;;  %1974 = vmatpush3.msra.mxu1 %v3026_v11 }
 0x28f   : > { %1463 = vmatprep.subr.mxu0 %v3027_v12  ;;  %1975 = vmatprep.subr.mxu1 %v3007_v41 }
 0x290   : > { %1464 = vmatpush1.msra.mxu0 %v3028_v13  ;;  %1976 = vmatpush3.msra.mxu1 %v3029_v14 }
 0x291   : > { %1465 = vmatprep.subr.mxu0 %v3030_v15  ;;  %1977 = vmatprep.subr.mxu1 %v3007_v41 }
 0x292   : > { %1466 = vmatpush1.msra.mxu0 %v3031_v17  ;;  %1499 = vmatprep.mubr.f32.mxu0 %v3007_v41 }
 0x293   : > { %1978 = vmatpush3.msra.mxu1 %v3032_v18  ;;  %1979 = vmatprep.mubr.msk.f32.mxu1 %vm2285_vm1, %v3007_v41 }
 0x32d   : > { %v1193_v22 = vpop.f32.mrf.mxu0  ;;  %v1264_v23 = vpop.f32.mrf.mxu1 }
 0x32e   : > { %v1268_v24 = vadd.f32 %v1193_v22, %v1053_v21  ;;  %v1282_v34 = vadd.f32 %v2721_v49, %v1264_v23 }
 0x32f   : > { %v1939_v25 = vpop.f32.mrf.mxu1  ;;  %v1195_v27 = vpop.f32.mrf.mxu0 }
 0x330   : > { %v1721_v26 = vmul.f32 -1.442695, %v1268_v24  ;;  %v1275_v29 = vadd.f32 %v1195_v27, %v1055_v28 }
 0x332   : > { %2092 = vpow2.f32 %v1721_v26  ;;  %v1722_v30 = vmul.f32 -1.442695, %v1275_v29 }
 0x333   : > { %v1431_v61 = vpop.f32.mrf.mxu1  ;;  %v1360_v46 = vpop.f32.mrf.mxu0 }
 0x334   : > { %2094 = vpow2.f32 %v1722_v30  ;;  %v1361_v1 = vadd.f32 %v1360_v46, %v2712_v58  ;;  %v1432_v58 = vadd.f32 %v1431_v61, %v2723_v47 }
 0x335   : > { %v1946_v41 = vpop.f32.mrf.mxu1  ;;  %v1362_v0 = vpop.f32.mrf.mxu0 }
 0x336   : > { %v1363_v57 = vadd.f32 %v1362_v0, %v2715_v5 }
 0x33f   : > { %v2093_v31 = vpop.eup %2092 }
 0x340   : > { %v1272_v32 = vadd.f32 1.0, %v2093_v31 }
 0x341   : > { %v2095_v33 = vpop.eup %2094 }
 0x342   : > { %2096 = vrcp.f32 %v1272_v32  ;;  %v1279_v39 = vadd.f32 1.0, %v2095_v33 }
 0x34f   : > { %v2097_v35 = vpop.eup %2096 }
 0x350   : > { %v1283_v37 = vmul.f32 %v2097_v35, %v1282_v34 }
 0x352   : > { %v1284_v38 = vadd.f32 %v1283_v37, %v1124_v36 }
 0x354   : > { %2098 = vtanh.f32 %v1284_v38 }
 0x355   : > { %2100 = vrcp.f32 %v1279_v39 }
 0x361   : > { %v2099_v42 = vpop.eup %2098 }
 0x362   : > { %v1286_v45 = vsub.f32 %v2821_v63, %v2099_v42  ;;  %v2101_v48 = vpop.eup %2100 }
 0x364   : > { %v1287_v51 = vmul.f32 %v2101_v48, %v1286_v45 }
 0x366   : > { %v1288_v53 = vadd.f32 %v2099_v42, %v1287_v51 }
 0x368   : > { %1500 = vmatmul.mubr.f32.vlgmr.msra.gmra.mxu0 %v1288_v53  ;;  %1980 = vmatmul.mubr.f32.vlgmr.msra.gmra.mxu1 %v1288_v53 }
 0x428   : > { %v1501_v55 = vpop.f32.mrf.mxu0  ;;  %v1572_v52 = vpop.f32.mrf.mxu1 }
 0x429   : > { %v1576_v59 = vadd.f32 %v1501_v55, %v1361_v1  ;;  %v1590_v63 = vadd.f32 %v2721_v49, %v1572_v52 }
 0x42a   : > { %v1981_v62 = vpop.f32.mrf.mxu1  ;;  %v1503_v6 = vpop.f32.mrf.mxu0 }
 0x42b   : > { %v1726_v60 = vmul.f32 -1.442695, %v1576_v59  ;;  %v1583_v44 = vadd.f32 %v1503_v6, %v1363_v57 }
 0x42d   : > { %2102 = vpow2.f32 %v1726_v60  ;;  %v1727_v43 = vmul.f32 -1.442695, %v1583_v44 }
 0x42f   : > { %2104 = vpow2.f32 %v1727_v43 }
 0x43a   : > { %v2103_v56 = vpop.eup %2102 }
 0x43b   : > { %v1580_v50 = vadd.f32 1.0, %v2103_v56 }
 0x43c   : > { %v2105_v54 = vpop.eup %2104 }
 0x43d   : > { %2106 = vrcp.f32 %v1580_v50  ;;  %v1587_v3 = vadd.f32 1.0, %v2105_v54 }
 0x44a   : > { %v2107_v2 = vpop.eup %2106 }
 0x44b   : > { %v1591_v16 = vmul.f32 %v2107_v2, %v1590_v63 }
 0x44d   : > { %v1592_v40 = vadd.f32 %v1591_v16, %v1432_v58 }
 0x44f   : > { %2108 = vtanh.f32 %v1592_v40 }
 0x450   : > { %2110 = vrcp.f32 %v1587_v3 }
 0x45c   : > { %v2109_v4 = vpop.eup %2108 }
 0x45d   : > { %v1594_v7 = vsub.f32 %v1288_v53, %v2109_v4  ;;  %v2111_v5 = vpop.eup %2110 }
 0x45f   : > { %v1595_v8 = vmul.f32 %v2111_v5, %v1594_v7  ;;  %1601 = sbr.rel (%p1728_p4) target bundleno = 1132 (0x46c), region = 60 }
 0x461   : > { %v1596_v9 = vadd.f32 %v2109_v4, %v1595_v8 }
 0x463   : > { %1597 = vst [vmem:[#allocation2] sm:$0xff] %v1596_v9 }
 0x46a   : > { %v1602_v10 = vld [vmem:[#allocation2] sm:$0xff] }
 0x46b   : > { %1603 = vst [vmem:[#allocation9] sm:$0xff] %v1602_v10 }
 0x46c PF: > { %p2919_p2 = scmp.eq.s32.totalorder %s1695_s24, 1  ;;  %s2286_s12 = smov [#allocation9]  }
 0x46d   : > { %s1613_s13 = sshll.u32 %s2286_s12, 4  ;;  %s1614_s13 = int_to_ptr.vmem [resolvable:$true] %s1613_s13 }
 0x46e   : > { %s2192_s14 = scalar_lea.vmem %s1614_s13, 128  ;;  %p2199_p9 = scmp.lt.s32.totalorder %s1614_s13, %s1614_s13 }
 0x46f   : > { %p2193_p3 = scmp.ne.s32.totalorder %s1614_s13, %s2192_s14  ;;  %p2200_p10 = scmp.lt.s32.totalorder %s2192_s14, %s2192_s14 }
 0x471   : > { %p2194_p7 = pnand %p2193_p3, %p2919_p2  ;;  %p2201_p12 = por %p2200_p10, %p2199_p9 }
 0x473   : > { %p2195_p6 = pneg %p2194_p7 }
 0x475   : > { %p2202_p11 = pnand %p2201_p12, %p2195_p6 }
 0x477   : > { %2205 = shalt.err (!%p2202_p11)
}
 0x478   : > { %1993 = dma.vmem_to_hbm [thread:$0]  (%p2919_p2), %s1614_s13, 128, %s2957_s5, [#allocation5]  }
 0x479   : > { %2249 = dma.done.wait (%p2919_p2), [#allocation5], 128  }
 0x47a   : > { %2251 = vsyncadd (%p2919_p2), [#allocation5], 4294967168 }
 0x47b PF: > { %s20_s23 = sadd.s32 1, %s2274_s23   ;;  %s3034_s18 = smov %s2258_s19 }
 0x47c   : > { %p17_p1 = scmp.ge.s32.totalorder %s20_s23, 4   ;;  %s3035_s19 = smov %s2262_s20 }
 0x47d   : > { %s3036_s20 = smov %s2404_s6  ;;  %s3037_s21 = smov %s2270_s22 }
 0x47e   : > { %s3038_s22 = smov %s3040_s16  ;;  %19 = sbr.rel (!%p17_p1) target bundleno = 6 (0x6), region = 97 }
 0x483   :  { %1626 = vsyncpa [#allocation4], 1 }
 0x484   :  { %1628 = vsyncpa [#allocation4 + $0x1], 1 }
 0x485   :  { %1629 = vsyncpa [#allocation7], 1 }
 0x486   :  { %1630 = vsyncpa [#allocation5], 1 }
 0x487   :  { %1632 = vsyncpa [#allocation5 + $0x1], 1 }

// kernel: tpu_custom_call.1
= control target key start
LH: loop header
LB: loop body
LE: loop exit
PB: predicated region body
PF: predicated region fallthrough
CT: control target
= control target key end

     0   :  { %10 = vsyncpa [#allocation4], 0  ;;  %s2952_s0 = inlined_call_operand.hbm [shape: f32[8,8,16], index: 0, kind: input, shape index: {}]   ;;  %s2953_s1 = inlined_call_operand.hbm [shape: f32[16,384], index: 1, kind: input, shape index: {}]   ;;  %s2954_s2 = inlined_call_operand.hbm [shape: f32[128,384], index: 2, kind: input, shape index: {}]   ;;  %s2955_s3 = inlined_call_operand.vmem [shape: f32[1,384], index: 3, kind: input, shape index: {}]   ;;  %s2956_s4 = inlined_call_operand.vmem [shape: f32[1,128], index: 4, kind: input, shape index: {}]   ;;  %s2957_s5 = inlined_call_operand.hbm [shape: f32[8,128], index: 5, kind: output, shape index: {}]  }
   0x1   :  { %12 = vsyncpa [#allocation4 + $0x1], 0 }
   0x2   :  { %13 = vsyncpa [#allocation7], 0 }
   0x3   :  { %14 = vsyncpa [#allocation5], 0  ;;  %s2317_s18 = smov 0   ;;  %s2319_s19 = smov 0  }
   0x4   :  { %s2321_s20 = smov 0   ;;  %s2323_s21 = smov 0  }
   0x5   :  { %s2325_s22 = smov 0   ;;  %s2327_s23 = smov 0  }
   0x6 LB: > { %s1695_s24 = sadd.s32 4294967295, %s2274_s23   ;;  %p54_p0 = scmp.ne.s32.totalorder %s2258_s19, %s2254_s18  ;;  %s2274_s23 = sphi %s2327_s23, %s20_s23   ;;  %s2270_s22 = sphi %s2325_s22, %s3038_s22   ;;  %s2266_s21 = sphi %s2323_s21, %s3037_s21   ;;  %s2262_s20 = sphi %s2321_s20, %s3036_s20   ;;  %s2258_s19 = sphi %s2319_s19, %s3035_s19   ;;  %s2254_s18 = sphi %s2317_s18, %s3034_s18  }
   0x7   : > { %p2349_p1 = scmp.eq.s32.totalorder %s1695_s24, 0  ;;  %p1696_p2 = scmp.ge.s32.totalorder %s2274_s23, 1 }
   0x8   : > { %p175_p3 = scmp.lt.s32.totalorder %s2274_s23, 3  ;;  %s2276_s28 = smov [#allocation6]  }
   0x9   : > { %s2987_s25 = scalar_select %p2349_p1, 1, 0 }
   0xa   : > { %p2357_p4 = por %p2349_p1, %p54_p0  ;;  %p2361_p5 = pnand %p1696_p2, %p175_p3 }
   0xb   : > { %s187_s29 = sshll.u32 %s2276_s28, 4  ;;  %s2277_s6 = smov [#allocation8]   ;;  %s188_s29 = int_to_ptr.vmem [resolvable:$true] %s187_s29 }
   0xc   : > { %p1996_p6 = pneg %p2361_p5  ;;  %s200_s7 = sshll.u32 %s2277_s6, 4  ;;  %s201_s7 = int_to_ptr.vmem [resolvable:$true] %s200_s7 }
   0xd   : > { %s2123_s8 = scalar_lea.vmem %s188_s29, 768  ;;  %p2131_p12 = scmp.lt.s32.totalorder %s188_s29, %s188_s29 }
   0xe   : > { %p2369_p7 = pnand %p1996_p6, %p2349_p1  ;;  %p2124_p9 = scmp.ne.s32.totalorder %s188_s29, %s2123_s8 }
   0xf   : > { %p2132_p13 = scmp.lt.s32.totalorder %s2123_s8, %s2123_s8 }
  0x10   : > { %p2114_p8 = pneg %p2369_p7 }
  0x11   : > { %p2133_p0 = por %p2132_p13, %p2131_p12 }
  0x12   : > { %p2126_p10 = pnand %p2124_p9, %p2114_p8 }
  0x14   : > { %p2127_p11 = pneg %p2126_p10 }
  0x16   : > { %p2134_p2 = pnand %p2133_p0, %p2127_p11 }
  0x18   : > { %2137 = shalt.err (!%p2134_p2)
}
  0x19   : > { %s2278_s9 = smov 384   ;;  %s2279_s10 = smov 24  }
  0x1a   : > { %1999 = dma.hbm_to_vmem [thread:$0]  (!%p2369_p7), %s2953_s1, 768, %s188_s29, [#allocation7], %s2278_s9, %s2278_s9, %s2279_s10  }
  0x1b   : > { %s2149_s13 = scalar_lea.vmem %s201_s7, 6144  ;;  %p2157_p10 = scmp.lt.s32.totalorder %s201_s7, %s201_s7 }
  0x1c   : > { %p2150_p3 = scmp.ne.s32.totalorder %s201_s7, %s2149_s13  ;;  %p2158_p1 = scmp.lt.s32.totalorder %s2149_s13, %s2149_s13 }
  0x1e   : > { %p2152_p6 = pnand %p2150_p3, %p2114_p8  ;;  %p2159_p12 = por %p2158_p1, %p2157_p10 }
  0x20   : > { %p2153_p9 = pneg %p2152_p6 }
  0x22   : > { %p2160_p11 = pnand %p2159_p12, %p2153_p9 }
  0x24   : > { %2163 = shalt.err (!%p2160_p11)
}
  0x25   : > { %2002 = dma.hbm_to_vmem [thread:$0]  (!%p2369_p7), %s2954_s2, 6144, %s201_s7, [#allocation7], %s2278_s9, %s2278_s9, %s2279_s10  }
  0x26   : > { %s29_s16 = sadd.s32 1, %s2270_s22  ;;  %s41_s17 = sadd.s32 1, %s2262_s20 }
  0x27   : > { %p30_p1 = scmp.ge.s32.totalorder %s29_s16, 2  ;;  %p48_p8 = scmp.ne.s32.totalorder %s2262_s20, %s2258_s19 }
  0x28   : > { %p49_p13 = scmp.eq.s32.totalorder %s2274_s23, 0  ;;  %p2009_p0 = scmp.lt.s32.totalorder %s2274_s23, 2 }
  0x29   : > { %s3040_s16 = smov (%p30_p1, %s29_s16), 0  ;;  %s220_s18 = sand.u32 1, %s2262_s20  }
  0x2a   : > { %p50_p2 = por %p49_p13, %p48_p8  ;;  %s36_s28 = ssub.s32 %s2270_s22, %s3040_s16 }
  0x2b   : > { %p39_p3 = scmp.eq.s32.totalorder %s36_s28, 0  ;;  %s1700_s29 = sshll.u32 %s220_s18, 5 }
  0x2c   : > { %s1733_s30 = sshll.u32 %s2270_s22, 9  ;;  %s224_s10 = scalar_lea.vmem [#allocation3], %s1700_s29 }
  0x2d   : > { %s2404_s6 = scalar_select %p39_p3, %s2262_s20, %s41_s17  }
  0x2e   : > { %s231_s9 = scalar_lea.hbm %s2952_s0, %s1733_s30  ;;  %s232_s11 = sshll.u32 %s224_s10, 4  ;;  %s233_s11 = int_to_ptr.vmem [resolvable:$true] %s232_s11 }
  0x2f   : > { %p2411_p7 = pnand %p2009_p0, %p50_p2  ;;  %s221_s13 = scalar_lea.sflag [#allocation4], %s220_s18 }
  0x30   : > { %s2177_s14 = scalar_lea.vmem %s233_s11, 512  ;;  %s2280_s15 = smov [#allocation3]  }
  0x31   : > { %p2166_p6 = pneg %p2411_p7  ;;  %p2178_p9 = scmp.ne.s32.totalorder %s233_s11, %s2177_s14 }
  0x32   : > { %s2182_s17 = sshll.u32 %s2280_s15, 4  ;;  %s2183_s17 = int_to_ptr.vmem [resolvable:$false] %s2182_s17 }
  0x33   : > { %p2180_p10 = pnand %p2178_p9, %p2166_p6  ;;  %s2184_s28 = scalar_lea.vmem %s2183_s17, 1024 }
  0x34   : > { %p2185_p11 = scmp.lt.s32.totalorder %s233_s11, %s2183_s17  ;;  %p2186_p1 = scmp.lt.s32.totalorder %s2184_s28, %s2177_s14 }
  0x35   : > { %p2181_p12 = pneg %p2180_p10 }
  0x36   : > { %p2187_p8 = por %p2186_p1, %p2185_p11 }
  0x38   : > { %p2188_p13 = pnand %p2187_p8, %p2181_p12 }
  0x3a   : > { %2191 = shalt.err (!%p2188_p13)
}
  0x3b   : > { %s2281_s29 = smov 128   ;;  %s2282_s30 = smov 8  }
  0x3c   : > { %2006 = dma.hbm_to_vmem [thread:$0]  (!%p2411_p7), %s231_s9, 512, %s233_s11, %s221_s13, %s2281_s29, %s2281_s29, %s2282_s30  }
  0x3d   : > { %244 = sbr.rel (%p2361_p5) target bundleno = 1147 (0x47b), region = 40 }
  0x42   : > { %s246_s18 = sand.u32 1, %s2258_s19  }
  0x43   : > { %s1704_s8 = sshll.u32 %s246_s18, 5  ;;  %s247_s7 = scalar_lea.sflag [#allocation4], %s246_s18 }
  0x44   : > { %s2422_s10 = scalar_lea.vmem [#allocation3], %s1704_s8 }
  0x45   : > { %2241 = dma.done.wait (%p2357_p4), %s247_s7, 512  }
  0x46   : > { %2243 = vsyncadd (%p2357_p4), %s247_s7, 4294966784  ;;  %p2992_p0 = scmp.ne.s32.totalorder %s2987_s25, 0 }
  0x48   : > { %2245 = dma.done.wait (%p2992_p0), [#allocation7], 6912  }
  0x49   : > { %2247 = vsyncadd (%p2992_p0), [#allocation7], 4294960384  ;;  %p1707_p5 = scmp.ne.s32.totalorder %s2266_s21, 0 }
  0x4b   : > { %284 = sbr.rel (%p1707_p5) target bundleno = 82 (0x52), region = 56 }
  0x50   : > { %v2283_v0 = vmov 0.0  }
  0x51   : > { %285 = vst [vmem:[#allocation2] sm:$0xff] %v2283_v0 }
  0x52 PF: > { %v2433_v1 = vld [vmem:[#allocation6 + $0x20] sm:$0xff]  ;;  %v2435_v2 = vld [vmem:[#allocation6 + $0x18] sm:$0xff]  ;;  %v2437_v3 = vld [vmem:[#allocation6 + $0x8] sm:$0xff]  ;;  %v2971_v5 = vmov 0.0   ;;  %vm366_vm0 = vcmask 130048   ;;  %vm2285_vm1 = vmmov 0   ;;  %v342_v61 = vlaneseq }
  0x53   : > { %2993 = vst [vmem:[#allocation13_spill] sm:$0xff] %v2433_v1  ;;  %398 = vmatprep.subr.mxu0 %v2433_v1  ;;  %v2440_v4 = vld [vmem:[#allocation6] sm:$0xff]  ;;  %434 = vmatprep.mubr.f32.mxu0 %v2971_v5  ;;  %v2449_v8 = vld [vmem:[#allocation8 + $0x168] sm:$0xff]  ;;  %v2454_v9 = vld [vmem:[#allocation8 + $0x158] sm:$0xff]  ;;  %p1728_p4 = scmp.ne.s32.totalorder %s2266_s21, 1 }
  0x54   : > { %399 = vmatpush1.msra.mxu0 %v2435_v2  ;;  %v365_v6 = vld [vmem:[%s2422_s10] sm:$0xff]  ;;  %1814 = vmatprep.subr.mxu1 %v2971_v5  ;;  %v2461_v11 = vld [vmem:[#allocation8 + $0x140] sm:$0xff]  ;;  %v2465_v12 = vld [vmem:[#allocation8 + $0x138] sm:$0xff]  ;;  %v343_v62 = vshrl.u32 %v342_v61, 7 }
  0x55   : > { %v2445_v7 = vld [vmem:[#allocation8 + $0x170] sm:$0xff]  ;;  %400 = vmatprep.subr.mxu0 %v2437_v3  ;;  %1818 = vmatprep.mubr.msk.f32.mxu1 %vm2285_vm1, %v2971_v5  ;;  %v2468_v13 = vld [vmem:[#allocation8 + $0x128] sm:$0xff]  ;;  %v2471_v14 = vld [vmem:[#allocation8 + $0x120] sm:$0xff] }
  0x56   : > { %401 = vmatpush1.msra.mxu0 %v2440_v4  ;;  %v2458_v10 = vld [vmem:[#allocation8 + $0x150] sm:$0xff]  ;;  %v2476_v16 = vld [vmem:[#allocation6 + $0x28] sm:$0xff]  ;;  %v2479_v17 = vld [vmem:[#allocation8 + $0x108] sm:$0xff]  ;;  %v344_v63 = vsub.s32 0, %v343_v62 }
  0x57   : > { %1709 = vmatmul.mubr.msk.f32.vlgmr.msra.gmra.mxu0 %vm366_vm0, %v365_v6  ;;  %511 = vmatprep.subr.mxu0 %v2445_v7  ;;  %v2474_v15 = vld [vmem:[#allocation8 + $0x110] sm:$0xff]  ;;  %v2482_v18 = vld [vmem:[#allocation6 + $0x10] sm:$0xff]  ;;  %v2485_v19 = vld [vmem:[#allocation8 + $0xf8] sm:$0xff] }
  0x58   : > { %512 = vmatpush1.msra.mxu0 %v2449_v8  ;;  %575 = vmatprep.mubr.f32.mxu0 %v2971_v5  ;;  %v2489_v20 = vld [vmem:[#allocation8 + $0xf0] sm:$0xff]  ;;  %v2492_v21 = vld [vmem:[#allocation8 + $0x178] sm:$0xff]  ;;  %v2495_v22 = vld [vmem:[#allocation8 + $0xe0] sm:$0xff] }
  0x59   : > { %513 = vmatprep.subr.mxu0 %v2454_v9  ;;  %1815 = vmatpush3.msra.mxu1 %v2476_v16  ;;  %v2499_v23 = vld [vmem:[#allocation8 + $0xd8] sm:$0xff]  ;;  %v2502_v24 = vld [vmem:[#allocation8 + $0x160] sm:$0xff]  ;;  %v2505_v25 = vld [vmem:[#allocation8 + $0xc8] sm:$0xff] }
  0x5a   : > { %514 = vmatpush1.msra.mxu0 %v2458_v10  ;;  %1816 = vmatprep.subr.mxu1 %v2971_v5  ;;  %v2509_v26 = vld [vmem:[#allocation8 + $0xc0] sm:$0xff]  ;;  %v2512_v27 = vld [vmem:[#allocation8 + $0x148] sm:$0xff]  ;;  %v2515_v28 = vld [vmem:[#allocation8 + $0xb0] sm:$0xff] }
  0x5b   : > { %515 = vmatprep.subr.mxu0 %v2461_v11  ;;  %1817 = vmatpush3.msra.mxu1 %v2482_v18  ;;  %v2519_v29 = vld [vmem:[#allocation8 + $0xa8] sm:$0xff]  ;;  %v2522_v30 = vld [vmem:[#allocation8 + $0x130] sm:$0xff]  ;;  %v2525_v31 = vld [vmem:[#allocation8 + $0x98] sm:$0xff] }
  0x5c   : > { %516 = vmatpush1.msra.mxu0 %v2465_v12  ;;  %1821 = vmatprep.subr.mxu1 %v2971_v5  ;;  %v2529_v32 = vld [vmem:[#allocation8 + $0x90] sm:$0xff]  ;;  %v2532_v33 = vld [vmem:[#allocation8 + $0x118] sm:$0xff]  ;;  %v2535_v34 = vld [vmem:[#allocation8 + $0x80] sm:$0xff] }
  0x5d   : > { %517 = vmatprep.subr.mxu0 %v2468_v13  ;;  %1819 = vmatmul.mubr.msk.f32.vlgmr.msra.gmra.mxu1 %vm366_vm0, %v365_v6  ;;  %v2539_v35 = vld [vmem:[#allocation8 + $0x78] sm:$0xff]  ;;  %v2542_v36 = vld [vmem:[#allocation8 + $0x100] sm:$0xff]  ;;  %v2545_v37 = vld [vmem:[#allocation8 + $0x68] sm:$0xff] }
  0x5e   : > { %518 = vmatpush1.msra.mxu0 %v2471_v14  ;;  %1822 = vmatpush3.msra.mxu1 %v2492_v21  ;;  %v2549_v38 = vld [vmem:[#allocation8 + $0x60] sm:$0xff]  ;;  %v2552_v39 = vld [vmem:[#allocation8 + $0xe8] sm:$0xff]  ;;  %v2555_v40 = vld [vmem:[#allocation8 + $0x50] sm:$0xff] }
  0x5f   : > { %519 = vmatprep.subr.mxu0 %v2474_v15  ;;  %1823 = vmatprep.subr.mxu1 %v2971_v5  ;;  %2994 = vst [vmem:[#allocation14_spill] sm:$0xff] %v2555_v40  ;;  %v2559_v41 = vld [vmem:[#allocation8 + $0x48] sm:$0xff]  ;;  %v2562_v42 = vld [vmem:[#allocation8 + $0xd0] sm:$0xff]  ;;  %v2565_v43 = vld [vmem:[#allocation8 + $0x38] sm:$0xff] }
  0x60   : > { %520 = vmatpush1.msra.mxu0 %v2479_v17  ;;  %1824 = vmatpush3.msra.mxu1 %v2502_v24  ;;  %2995 = vst [vmem:[#allocation15_spill] sm:$0xff] %v2559_v41  ;;  %2996 = vst [vmem:[#allocation16_spill] sm:$0xff] %v2565_v43  ;;  %v2569_v44 = vld [vmem:[#allocation8 + $0x30] sm:$0xff]  ;;  %v2572_v45 = vld [vmem:[#allocation8 + $0xb8] sm:$0xff] }
  0x61   : > { %521 = vmatprep.subr.mxu0 %v2485_v19  ;;  %1825 = vmatprep.subr.mxu1 %v2971_v5  ;;  %2997 = vst [vmem:[#allocation17_spill] sm:$0xff] %v2569_v44  ;;  %v2575_v46 = vld [vmem:[#allocation8 + $0x20] sm:$0xff]  ;;  %v2579_v47 = vld [vmem:[#allocation8 + $0x18] sm:$0xff]  ;;  %v2585_v49 = vld [vmem:[#allocation8 + $0x8] sm:$0xff] }
  0x62   : > { %522 = vmatpush1.msra.mxu0 %v2489_v20  ;;  %1826 = vmatpush3.msra.mxu1 %v2512_v27  ;;  %2998 = vst [vmem:[#allocation18_spill] sm:$0xff] %v2575_v46  ;;  %2999 = vst [vmem:[#allocation19_spill] sm:$0xff] %v2579_v47  ;;  %v2582_v48 = vld [vmem:[#allocation8 + $0xa0] sm:$0xff]  ;;  %v2592_v51 = vld [vmem:[#allocation8 + $0x88] sm:$0xff] }
  0x63   : > { %523 = vmatprep.subr.mxu0 %v2495_v22  ;;  %1827 = vmatprep.subr.mxu1 %v2971_v5  ;;  %3000 = vst [vmem:[#allocation20_spill] sm:$0xff] %v2585_v49  ;;  %v2589_v50 = vld [vmem:[#allocation8] sm:$0xff]  ;;  %v2595_v52 = vld [vmem:[#allocation2] sm:$0xff]  ;;  %v2600_v53 = vld [vmem:[#allocation8 + $0x70] sm:$0xff] }
  0x64   : > { %524 = vmatpush1.msra.mxu0 %v2499_v23  ;;  %1828 = vmatpush3.msra.mxu1 %v2522_v30  ;;  %3001 = vst [vmem:[#allocation21_spill] sm:$0xff] %v2589_v50  ;;  %3002 = vst [vmem:[#allocation22_spill] sm:$0xff] %v2600_v53  ;;  %v2606_v54 = vld [vmem:[#allocation8 + $0x58] sm:$0xff]  ;;  %v2612_v55 = vld [vmem:[#allocation8 + $0x40] sm:$0xff] }
  0x65   : > { %525 = vmatprep.subr.mxu0 %v2505_v25  ;;  %1829 = vmatprep.subr.mxu1 %v2971_v5  ;;  %3003 = vst [vmem:[#allocation23_spill] sm:$0xff] %v2606_v54  ;;  %3004 = vst [vmem:[#allocation24_spill] sm:$0xff] %v2612_v55  ;;  %v2618_v56 = vld [vmem:[#allocation8 + $0x28] sm:$0xff]  ;;  %v2624_v57 = vld [vmem:[#allocation8 + $0x10] sm:$0xff] }
  0x66   : > { %526 = vmatpush1.msra.mxu0 %v2509_v26  ;;  %1830 = vmatpush3.msra.mxu1 %v2532_v33  ;;  %3005 = vst [vmem:[#allocation25_spill] sm:$0xff] %v2618_v56  ;;  %3006 = vst [vmem:[#allocation26_spill] sm:$0xff] %v2624_v57  ;;  %v1713_v58 = vld [vmem:[%s2422_s10 + $0x8] sm:$0xff]  ;;  %v340_v0 = vld [vmem:[%s2955_s3] sm:$0x7] }
  0x67   : > { %527 = vmatprep.subr.mxu0 %v2515_v28  ;;  %1831 = vmatprep.subr.mxu1 %v2971_v5 }
  0x68   : > { %528 = vmatpush1.msra.mxu0 %v2519_v29  ;;  %1832 = vmatpush3.msra.mxu1 %v2542_v36 }
  0x69   : > { %529 = vmatprep.subr.mxu0 %v2525_v31  ;;  %1833 = vmatprep.subr.mxu1 %v2971_v5 }
  0x6a   : > { %530 = vmatpush1.msra.mxu0 %v2529_v32  ;;  %1834 = vmatpush3.msra.mxu1 %v2552_v39 }
  0x6b   : > { %531 = vmatprep.subr.mxu0 %v2535_v34  ;;  %1835 = vmatprep.subr.mxu1 %v2971_v5 }
  0x6c   : > { %532 = vmatpush1.msra.mxu0 %v2539_v35  ;;  %1836 = vmatpush3.msra.mxu1 %v2562_v42 }
  0x6d   : > { %533 = vmatprep.subr.mxu0 %v2545_v37  ;;  %1837 = vmatprep.subr.mxu1 %v2971_v5 }
  0x6e   : > { %534 = vmatpush1.msra.mxu0 %v2549_v38  ;;  %1838 = vmatpush3.msra.mxu1 %v2572_v45 }
  0x6f   : > { %535 = vmatprep.subr.mxu0 %v2555_v40  ;;  %1839 = vmatprep.subr.mxu1 %v2971_v5 }
  0x70   : > { %536 = vmatpush1.msra.mxu0 %v2559_v41  ;;  %1840 = vmatpush3.msra.mxu1 %v2582_v48 }
  0x71   : > { %537 = vmatprep.subr.mxu0 %v2565_v43  ;;  %1841 = vmatprep.subr.mxu1 %v2971_v5 }
  0x72   : > { %538 = vmatpush1.msra.mxu0 %v2569_v44  ;;  %1842 = vmatpush3.msra.mxu1 %v2592_v51 }
  0x73   : > { %539 = vmatprep.subr.mxu0 %v2575_v46  ;;  %1843 = vmatprep.subr.mxu1 %v2971_v5 }
  0x74   : > { %540 = vmatpush1.msra.mxu0 %v2579_v47  ;;  %1844 = vmatpush3.msra.mxu1 %v2600_v53 }
  0x75   : > { %541 = vmatprep.subr.mxu0 %v2585_v49  ;;  %1853 = vmatprep.mubr.msk.f32.mxu1 %vm2285_vm1, %v2971_v5 }
  0x76   : > { %542 = vmatpush1.msra.mxu0 %v2589_v50  ;;  %1845 = vmatprep.subr.mxu1 %v2971_v5 }
  0x77   : > { %576 = vmatmul.mubr.f32.vlgmr.msra.gmra.mxu0 %v2595_v52  ;;  %706 = vmatprep.subr.mxu0 %v2433_v1 }
  0x78   : > { %1846 = vmatpush3.msra.mxu1 %v2606_v54  ;;  %707 = vmatpush1.msra.mxu0 %v2435_v2 }
  0x79   : > { %1847 = vmatprep.subr.mxu1 %v2971_v5  ;;  %708 = vmatprep.subr.mxu0 %v2437_v3 }
  0x7a   : > { %1848 = vmatpush3.msra.mxu1 %v2612_v55  ;;  %709 = vmatpush1.msra.mxu0 %v2440_v4 }
  0x7b   : > { %1849 = vmatprep.subr.mxu1 %v2971_v5  ;;  %742 = vmatprep.mubr.f32.mxu0 %v2971_v5 }
  0x7c   : > { %1850 = vmatpush3.msra.mxu1 %v2618_v56  ;;  %819 = vmatprep.subr.mxu0 %v2445_v7 }
  0x7d   : > { %1851 = vmatprep.subr.mxu1 %v2971_v5  ;;  %1714 = vmatmul.mubr.msk.f32.vlgmr.msra.gmra.mxu0 %vm366_vm0, %v1713_v58 }
  0x7e   : > { %1852 = vmatpush3.msra.mxu1 %v2624_v57  ;;  %820 = vmatpush1.msra.mxu0 %v2449_v8 }
  0x7f   : > { %1854 = vmatmul.mubr.f32.vlgmr.msra.gmra.mxu1 %v2595_v52  ;;  %1856 = vmatprep.subr.mxu1 %v2971_v5 }
  0x80   : > { %1857 = vmatpush3.msra.mxu1 %v2476_v16  ;;  %1860 = vmatprep.mubr.msk.f32.mxu1 %vm2285_vm1, %v2971_v5 }
  0x81   : > { %1858 = vmatprep.subr.mxu1 %v2971_v5  ;;  %821 = vmatprep.subr.mxu0 %v2454_v9 }
  0x82   : > { %1859 = vmatpush3.msra.mxu1 %v2482_v18  ;;  %822 = vmatpush1.msra.mxu0 %v2458_v10 }
  0x83   : > { %1863 = vmatprep.subr.mxu1 %v2971_v5  ;;  %1861 = vmatmul.mubr.msk.f32.vlgmr.msra.gmra.mxu1 %vm366_vm0, %v1713_v58  ;;  %v2712_v58 = vrot.slane %v340_v0, %v344_v63 }
  0x84   : > { %1864 = vmatpush3.msra.mxu1 %v2492_v21  ;;  %823 = vmatprep.subr.mxu0 %v2461_v11 }
  0x85   : > { %1865 = vmatprep.subr.mxu1 %v2971_v5  ;;  %824 = vmatpush1.msra.mxu0 %v2465_v12 }
  0x86   : > { %1866 = vmatpush3.msra.mxu1 %v2502_v24  ;;  %825 = vmatprep.subr.mxu0 %v2468_v13 }
  0x87   : > { %1867 = vmatprep.subr.mxu1 %v2971_v5  ;;  %826 = vmatpush1.msra.mxu0 %v2471_v14 }
  0x88   : > { %1868 = vmatpush3.msra.mxu1 %v2512_v27  ;;  %827 = vmatprep.subr.mxu0 %v2474_v15 }
  0x89   : > { %1869 = vmatprep.subr.mxu1 %v2971_v5  ;;  %828 = vmatpush1.msra.mxu0 %v2479_v17 }
  0x8a   : > { %1870 = vmatpush3.msra.mxu1 %v2522_v30  ;;  %829 = vmatprep.subr.mxu0 %v2485_v19 }
  0x8b   : > { %1871 = vmatprep.subr.mxu1 %v2971_v5  ;;  %830 = vmatpush1.msra.mxu0 %v2489_v20 }
  0x8c   : > { %1872 = vmatpush3.msra.mxu1 %v2532_v33  ;;  %831 = vmatprep.subr.mxu0 %v2495_v22 }
  0x8d   : > { %1873 = vmatprep.subr.mxu1 %v2971_v5  ;;  %832 = vmatpush1.msra.mxu0 %v2499_v23 }
  0x8e   : > { %1874 = vmatpush3.msra.mxu1 %v2542_v36  ;;  %833 = vmatprep.subr.mxu0 %v2505_v25 }
  0x8f   : > { %1875 = vmatprep.subr.mxu1 %v2971_v5  ;;  %834 = vmatpush1.msra.mxu0 %v2509_v26 }
  0x90   : > { %1876 = vmatpush3.msra.mxu1 %v2552_v39  ;;  %835 = vmatprep.subr.mxu0 %v2515_v28 }
  0x91   : > { %1877 = vmatprep.subr.mxu1 %v2971_v5  ;;  %836 = vmatpush1.msra.mxu0 %v2519_v29 }
  0x92   : > { %1878 = vmatpush3.msra.mxu1 %v2562_v42  ;;  %837 = vmatprep.subr.mxu0 %v2525_v31 }
  0x93   : > { %1879 = vmatprep.subr.mxu1 %v2971_v5  ;;  %838 = vmatpush1.msra.mxu0 %v2529_v32 }
  0x94   : > { %1880 = vmatpush3.msra.mxu1 %v2572_v45  ;;  %839 = vmatprep.subr.mxu0 %v2535_v34 }
  0x95   : > { %1881 = vmatprep.subr.mxu1 %v2971_v5  ;;  %840 = vmatpush1.msra.mxu0 %v2539_v35 }
  0x96   : > { %1882 = vmatpush3.msra.mxu1 %v2582_v48  ;;  %841 = vmatprep.subr.mxu0 %v2545_v37 }
  0x97   : > { %1883 = vmatprep.subr.mxu1 %v2971_v5  ;;  %842 = vmatpush1.msra.mxu0 %v2549_v38 }
  0x98   : > { %1884 = vmatpush3.msra.mxu1 %v2592_v51  ;;  %843 = vmatprep.subr.mxu0 %v2555_v40 }
  0x99   : > { %1885 = vmatprep.subr.mxu1 %v2971_v5  ;;  %844 = vmatpush1.msra.mxu0 %v2559_v41  ;;  %v352_v41 = vsub.s32 2, %v343_v62 }
  0x9a   : > { %1886 = vmatpush3.msra.mxu1 %v2600_v53  ;;  %845 = vmatprep.subr.mxu0 %v2565_v43 }
  0x9b   : > { %1887 = vmatprep.subr.mxu1 %v2971_v5  ;;  %846 = vmatpush1.msra.mxu0 %v2569_v44 }
  0x9c   : > { %1888 = vmatpush3.msra.mxu1 %v2606_v54  ;;  %847 = vmatprep.subr.mxu0 %v2575_v46 }
  0x9d   : > { %1889 = vmatprep.subr.mxu1 %v2971_v5  ;;  %848 = vmatpush1.msra.mxu0 %v2579_v47 }
  0x9e   : > { %1890 = vmatpush3.msra.mxu1 %v2612_v55  ;;  %849 = vmatprep.subr.mxu0 %v2585_v49 }
  0x9f   : > { %1891 = vmatprep.subr.mxu1 %v2971_v5  ;;  %850 = vmatpush1.msra.mxu0 %v2589_v50 }
  0xa0   : > { %1892 = vmatpush3.msra.mxu1 %v2618_v56  ;;  %883 = vmatprep.mubr.f32.mxu0 %v2971_v5 }
  0xa1   : > { %1893 = vmatprep.subr.mxu1 %v2971_v5  ;;  %1895 = vmatprep.mubr.msk.f32.mxu1 %vm2285_vm1, %v2971_v5 }
  0xa2   : > { %1894 = vmatpush3.msra.mxu1 %v2624_v57  ;;  %1014 = vmatprep.subr.mxu0 %v2433_v1  ;;  %v348_v1 = vsub.s32 1, %v343_v62 }
  0xa3   : > { %1898 = vmatprep.subr.mxu1 %v2971_v5 }
  0xa4   : > { %v2715_v5 = vrot.slane %v340_v0, %v348_v1 }
 0x117   : > { %v436_v6 = vpop.f32.mrf.mxu0 }
 0x118   : > { %v437_v50 = vadd.f32 %v436_v6, %v2712_v58 }
 0x119   : > { %v438_v57 = vpop.f32.mrf.mxu0 }
 0x11a   : > { %v439_v61 = vadd.f32 %v438_v57, %v2715_v5 }
 0x11d   : > { %v507_v59 = vpop.f32.mrf.mxu1 }
 0x11f   : > { %v1820_v60 = vpop.f32.mrf.mxu1 }
 0x137   : > { %v577_v49 = vpop.f32.mrf.mxu0 }
 0x138   : > { %v652_v56 = vadd.f32 %v577_v49, %v437_v50  ;;  %v2721_v49 = vld [vmem:[%s2956_s4] ss:$0 sm:$0xff] }
 0x139   : > { %v579_v60 = vpop.f32.mrf.mxu0 }
 0x13a   : > { %v1711_v47 = vmul.f32 -1.442695, %v652_v56  ;;  %v659_v55 = vadd.f32 %v579_v60, %v439_v61 }
 0x13c   : > { %2072 = vpow2.f32 %v1711_v47  ;;  %v1712_v43 = vmul.f32 -1.442695, %v659_v55  ;;  %v2723_v47 = vrot.slane %v340_v0, %v352_v41  ;;  %v3007_v41 = vmov 0.0   ;;  %v3008_v0 = vld [vmem:[#allocation15_spill] sm:$0xff] }
 0x13e   : > { %2074 = vpow2.f32 %v1712_v43  ;;  %v508_v57 = vadd.f32 %v507_v59, %v2723_v47  ;;  %v1718_v59 = vld [vmem:[%s2422_s10 + $0x10] sm:$0xff] }
 0x13f   : > { %v648_v46 = vpop.f32.mrf.mxu1 }
 0x140   : > { %v666_v1 = vadd.f32 %v2721_v49, %v648_v46 }
 0x141   : > { %v1855_v44 = vpop.f32.mrf.mxu1 }
 0x143   : > { %v2743_v46 = vpop.f32.mrf.mxu1 }
 0x149   : > { %v2073_v54 = vpop.eup %2072 }
 0x14a   : > { %v656_v63 = vadd.f32 1.0, %v2073_v54 }
 0x14b   : > { %v2075_v50 = vpop.eup %2074 }
 0x14c   : > { %2076 = vrcp.f32 %v656_v63  ;;  %v663_v55 = vadd.f32 1.0, %v2075_v50  ;;  %v3009_v63 = vld [vmem:[#allocation23_spill] sm:$0xff]  ;;  %v3011_v50 = vld [vmem:[#allocation17_spill] sm:$0xff] }
 0x159   : > { %v2077_v56 = vpop.eup %2076 }
 0x15a   : > { %v667_v44 = vmul.f32 %v2077_v56, %v666_v1  ;;  %v3010_v1 = vld [vmem:[#allocation16_spill] sm:$0xff] }
 0x15b   : > { %v3012_v56 = vld [vmem:[#allocation24_spill] sm:$0xff] }
 0x15c   : > { %v668_v6 = vadd.f32 %v667_v44, %v508_v57  ;;  %v3013_v57 = vld [vmem:[#allocation18_spill] sm:$0xff]  ;;  %v3014_v44 = vld [vmem:[#allocation19_spill] sm:$0xff] }
 0x15e   : > { %2078 = vtanh.f32 %v668_v6  ;;  %v3016_v6 = vld [vmem:[#allocation20_spill] sm:$0xff] }
 0x15f   : > { %2080 = vrcp.f32 %v663_v55  ;;  %v3015_v55 = vld [vmem:[#allocation25_spill] sm:$0xff] }
 0x16b   : > { %v2079_v43 = vpop.eup %2078 }
 0x16c   : > { %v670_v54 = vsub.f32 %v2595_v52, %v2079_v43  ;;  %v2081_v62 = vpop.eup %2080  ;;  %v1862_v52 = vpop.f32.mrf.mxu1 }
 0x16e   : > { %v671_v60 = vmul.f32 %v2081_v62, %v670_v54  ;;  %v3018_v54 = vld [vmem:[#allocation26_spill] sm:$0xff]  ;;  %v3019_v62 = vld [vmem:[#allocation13_spill] sm:$0xff] }
 0x170   : > { %v2728_v61 = vadd.f32 %v2079_v43, %v671_v60  ;;  %v3017_v43 = vld [vmem:[#allocation21_spill] sm:$0xff]  ;;  %v744_v60 = vpop.f32.mrf.mxu0 }
 0x172   : > { %884 = vmatmul.mubr.f32.vlgmr.msra.gmra.mxu0 %v2728_v61  ;;  %1896 = vmatmul.mubr.f32.vlgmr.msra.gmra.mxu1 %v2728_v61  ;;  %v746_v52 = vpop.f32.mrf.mxu0 }
 0x173   : > { %1015 = vmatpush1.msra.mxu0 %v2435_v2  ;;  %1899 = vmatpush3.msra.mxu1 %v2476_v16 }
 0x174   : > { %1016 = vmatprep.subr.mxu0 %v2437_v3  ;;  %1050 = vmatprep.mubr.f32.mxu0 %v3007_v41 }
 0x175   : > { %1017 = vmatpush1.msra.mxu0 %v2440_v4  ;;  %1900 = vmatprep.subr.mxu1 %v3007_v41 }
 0x176   : > { %1901 = vmatpush3.msra.mxu1 %v2482_v18  ;;  %1902 = vmatprep.mubr.msk.f32.mxu1 %vm2285_vm1, %v3007_v41 }
 0x177   : > { %1127 = vmatprep.subr.mxu0 %v2445_v7  ;;  %1905 = vmatprep.subr.mxu1 %v3007_v41 }
 0x178   : > { %1719 = vmatmul.mubr.msk.f32.vlgmr.msra.gmra.mxu0 %vm366_vm0, %v1718_v59  ;;  %1903 = vmatmul.mubr.msk.f32.vlgmr.msra.gmra.mxu1 %vm366_vm0, %v1718_v59  ;;  %v745_v59 = vadd.f32 %v744_v60, %v2712_v58  ;;  %v816_v60 = vadd.f32 %v2743_v46, %v2723_v47 }
 0x179   : > { %1128 = vmatpush1.msra.mxu0 %v2449_v8  ;;  %1906 = vmatpush3.msra.mxu1 %v2492_v21 }
 0x17a   : > { %1129 = vmatprep.subr.mxu0 %v2454_v9  ;;  %1907 = vmatprep.subr.mxu1 %v3007_v41 }
 0x17b   : > { %1130 = vmatpush1.msra.mxu0 %v2458_v10  ;;  %1908 = vmatpush3.msra.mxu1 %v2502_v24 }
 0x17c   : > { %1131 = vmatprep.subr.mxu0 %v2461_v11  ;;  %1909 = vmatprep.subr.mxu1 %v3007_v41 }
 0x17d   : > { %1132 = vmatpush1.msra.mxu0 %v2465_v12  ;;  %1910 = vmatpush3.msra.mxu1 %v2512_v27 }
 0x17e   : > { %1133 = vmatprep.subr.mxu0 %v2468_v13  ;;  %1911 = vmatprep.subr.mxu1 %v3007_v41 }
 0x17f   : > { %1134 = vmatpush1.msra.mxu0 %v2471_v14  ;;  %1912 = vmatpush3.msra.mxu1 %v2522_v30 }
 0x180   : > { %1135 = vmatprep.subr.mxu0 %v2474_v15  ;;  %1913 = vmatprep.subr.mxu1 %v3007_v41 }
 0x181   : > { %1136 = vmatpush1.msra.mxu0 %v2479_v17  ;;  %1914 = vmatpush3.msra.mxu1 %v2532_v33 }
 0x182   : > { %1137 = vmatprep.subr.mxu0 %v2485_v19  ;;  %1915 = vmatprep.subr.mxu1 %v3007_v41 }
 0x183   : > { %1138 = vmatpush1.msra.mxu0 %v2489_v20  ;;  %1916 = vmatpush3.msra.mxu1 %v2542_v36 }
 0x184   : > { %1139 = vmatprep.subr.mxu0 %v2495_v22  ;;  %1917 = vmatprep.subr.mxu1 %v3007_v41 }
 0x185   : > { %1140 = vmatpush1.msra.mxu0 %v2499_v23  ;;  %1918 = vmatpush3.msra.mxu1 %v2552_v39 }
 0x186   : > { %1141 = vmatprep.subr.mxu0 %v2505_v25  ;;  %1919 = vmatprep.subr.mxu1 %v3007_v41 }
 0x187   : > { %1142 = vmatpush1.msra.mxu0 %v2509_v26  ;;  %1920 = vmatpush3.msra.mxu1 %v2562_v42 }
 0x188   : > { %1143 = vmatprep.subr.mxu0 %v2515_v28  ;;  %1921 = vmatprep.subr.mxu1 %v3007_v41 }
 0x189   : > { %1144 = vmatpush1.msra.mxu0 %v2519_v29  ;;  %1922 = vmatpush3.msra.mxu1 %v2572_v45 }
 0x18a   : > { %1145 = vmatprep.subr.mxu0 %v2525_v31  ;;  %1923 = vmatprep.subr.mxu1 %v3007_v41 }
 0x18b   : > { %1146 = vmatpush1.msra.mxu0 %v2529_v32  ;;  %1924 = vmatpush3.msra.mxu1 %v2582_v48 }
 0x18c   : > { %1147 = vmatprep.subr.mxu0 %v2535_v34  ;;  %1925 = vmatprep.subr.mxu1 %v3007_v41 }
 0x18d   : > { %1148 = vmatpush1.msra.mxu0 %v2539_v35  ;;  %1926 = vmatpush3.msra.mxu1 %v2592_v51 }
 0x18e   : > { %1149 = vmatprep.subr.mxu0 %v2545_v37  ;;  %1927 = vmatprep.subr.mxu1 %v3007_v41 }
 0x18f   : > { %1150 = vmatpush1.msra.mxu0 %v2549_v38  ;;  %1928 = vmatpush3.msra.mxu1 %v2600_v53 }
 0x190   : > { %1151 = vmatprep.subr.mxu0 %v2555_v40  ;;  %1929 = vmatprep.subr.mxu1 %v3007_v41 }
 0x191   : > { %1152 = vmatpush1.msra.mxu0 %v3008_v0  ;;  %1930 = vmatpush3.msra.mxu1 %v3009_v63 }
 0x192   : > { %1153 = vmatprep.subr.mxu0 %v3010_v1  ;;  %1931 = vmatprep.subr.mxu1 %v3007_v41 }
 0x193   : > { %1154 = vmatpush1.msra.mxu0 %v3011_v50  ;;  %1932 = vmatpush3.msra.mxu1 %v3012_v56 }
 0x194   : > { %1155 = vmatprep.subr.mxu0 %v3013_v57  ;;  %1933 = vmatprep.subr.mxu1 %v3007_v41 }
 0x195   : > { %1156 = vmatpush1.msra.mxu0 %v3014_v44  ;;  %1934 = vmatpush3.msra.mxu1 %v3015_v55 }
 0x196   : > { %1157 = vmatprep.subr.mxu0 %v3016_v6  ;;  %1935 = vmatprep.subr.mxu1 %v3007_v41 }
 0x197   : > { %1158 = vmatpush1.msra.mxu0 %v3017_v43  ;;  %1191 = vmatprep.mubr.f32.mxu0 %v3007_v41 }
 0x198   : > { %1936 = vmatpush3.msra.mxu1 %v3018_v54  ;;  %1937 = vmatprep.mubr.msk.f32.mxu1 %vm2285_vm1, %v3007_v41  ;;  %v747_v54 = vadd.f32 %v746_v52, %v2715_v5 }
 0x199   : > { %1322 = vmatprep.subr.mxu0 %v3019_v62  ;;  %1940 = vmatprep.subr.mxu1 %v3007_v41 }
 0x232   : > { %v885_v6 = vpop.f32.mrf.mxu0  ;;  %v956_v55 = vpop.f32.mrf.mxu1 }
 0x233   : > { %v960_v44 = vadd.f32 %v885_v6, %v745_v59  ;;  %v974_v40 = vadd.f32 %v2721_v49, %v956_v55 }
 0x234   : > { %v1897_v57 = vpop.f32.mrf.mxu1  ;;  %v887_v56 = vpop.f32.mrf.mxu0 }
 0x235   : > { %v1716_v43 = vmul.f32 -1.442695, %v960_v44  ;;  %v967_v50 = vadd.f32 %v887_v56, %v747_v54 }
 0x237   : > { %2082 = vpow2.f32 %v1716_v43  ;;  %v1717_v1 = vmul.f32 -1.442695, %v967_v50 }
 0x239   : > { %2084 = vpow2.f32 %v1717_v1 }
 0x244   : > { %v2083_v63 = vpop.eup %2082 }
 0x245   : > { %v964_v0 = vadd.f32 1.0, %v2083_v63 }
 0x246   : > { %v2085_v62 = vpop.eup %2084 }
 0x247   : > { %2086 = vrcp.f32 %v964_v0  ;;  %v971_v44 = vadd.f32 1.0, %v2085_v62 }
 0x254   : > { %v2087_v53 = vpop.eup %2086 }
 0x255   : > { %v975_v6 = vmul.f32 %v2087_v53, %v974_v40  ;;  %v1723_v40 = vld [vmem:[%s2422_s10 + $0x18] sm:$0xff] }
 0x257   : > { %v976_v57 = vadd.f32 %v975_v6, %v816_v60 }
 0x259   : > { %2088 = vtanh.f32 %v976_v57 }
 0x25a   : > { %2090 = vrcp.f32 %v971_v44 }
 0x266   : > { %v2089_v43 = vpop.eup %2088 }
 0x267   : > { %v978_v56 = vsub.f32 %v2728_v61, %v2089_v43  ;;  %v2091_v50 = vpop.eup %2090 }
 0x269   : > { %v979_v54 = vmul.f32 %v2091_v50, %v978_v56 }
 0x26b   : > { %v2821_v63 = vadd.f32 %v2089_v43, %v979_v54 }
 0x26d   : > { %1192 = vmatmul.mubr.f32.vlgmr.msra.gmra.mxu0 %v2821_v63  ;;  %1938 = vmatmul.mubr.f32.vlgmr.msra.gmra.mxu1 %v2821_v63 }
 0x26e   : > { %1323 = vmatpush1.msra.mxu0 %v2435_v2  ;;  %1941 = vmatpush3.msra.mxu1 %v2476_v16  ;;  %v2836_v2 = vpop.f32.mrf.mxu1 }
 0x26f   : > { %1324 = vmatprep.subr.mxu0 %v2437_v3  ;;  %1358 = vmatprep.mubr.f32.mxu0 %v3007_v41  ;;  %v3020_v3 = vld [vmem:[#allocation22_spill] sm:$0xff] }
 0x270   : > { %1325 = vmatpush1.msra.mxu0 %v2440_v4  ;;  %1942 = vmatprep.subr.mxu1 %v3007_v41  ;;  %v1904_v16 = vpop.f32.mrf.mxu1  ;;  %v3021_v4 = vld [vmem:[#allocation14_spill] sm:$0xff] }
 0x271   : > { %1943 = vmatpush3.msra.mxu1 %v2482_v18  ;;  %1944 = vmatprep.mubr.msk.f32.mxu1 %vm2285_vm1, %v3007_v41  ;;  %v3032_v18 = vld [vmem:[#allocation26_spill] sm:$0xff] }
 0x272   : > { %1435 = vmatprep.subr.mxu0 %v2445_v7  ;;  %1947 = vmatprep.subr.mxu1 %v3007_v41  ;;  %v3022_v7 = vld [vmem:[#allocation15_spill] sm:$0xff] }
 0x273   : > { %1724 = vmatmul.mubr.msk.f32.vlgmr.msra.gmra.mxu0 %vm366_vm0, %v1723_v40  ;;  %1945 = vmatmul.mubr.msk.f32.vlgmr.msra.gmra.mxu1 %vm366_vm0, %v1723_v40 }
 0x274   : > { %1436 = vmatpush1.msra.mxu0 %v2449_v8  ;;  %1948 = vmatpush3.msra.mxu1 %v2492_v21  ;;  %v3023_v8 = vld [vmem:[#allocation23_spill] sm:$0xff] }
 0x275   : > { %1437 = vmatprep.subr.mxu0 %v2454_v9  ;;  %1949 = vmatprep.subr.mxu1 %v3007_v41  ;;  %v3024_v9 = vld [vmem:[#allocation16_spill] sm:$0xff] }
 0x276   : > { %1438 = vmatpush1.msra.mxu0 %v2458_v10  ;;  %1950 = vmatpush3.msra.mxu1 %v2502_v24  ;;  %v3025_v10 = vld [vmem:[#allocation17_spill] sm:$0xff] }
 0x277   : > { %1439 = vmatprep.subr.mxu0 %v2461_v11  ;;  %1951 = vmatprep.subr.mxu1 %v3007_v41  ;;  %v3026_v11 = vld [vmem:[#allocation24_spill] sm:$0xff] }
 0x278   : > { %1440 = vmatpush1.msra.mxu0 %v2465_v12  ;;  %1952 = vmatpush3.msra.mxu1 %v2512_v27  ;;  %v3027_v12 = vld [vmem:[#allocation18_spill] sm:$0xff] }
 0x279   : > { %1441 = vmatprep.subr.mxu0 %v2468_v13  ;;  %1953 = vmatprep.subr.mxu1 %v3007_v41  ;;  %v3028_v13 = vld [vmem:[#allocation19_spill] sm:$0xff] }
 0x27a   : > { %1442 = vmatpush1.msra.mxu0 %v2471_v14  ;;  %1954 = vmatpush3.msra.mxu1 %v2522_v30  ;;  %v3029_v14 = vld [vmem:[#allocation25_spill] sm:$0xff] }
 0x27b   : > { %1443 = vmatprep.subr.mxu0 %v2474_v15  ;;  %1955 = vmatprep.subr.mxu1 %v3007_v41  ;;  %v3030_v15 = vld [vmem:[#allocation20_spill] sm:$0xff] }
 0x27c   : > { %1444 = vmatpush1.msra.mxu0 %v2479_v17  ;;  %1956 = vmatpush3.msra.mxu1 %v2532_v33  ;;  %v3031_v17 = vld [vmem:[#allocation21_spill] sm:$0xff] }
 0x27d   : > { %1445 = vmatprep.subr.mxu0 %v2485_v19  ;;  %1957 = vmatprep.subr.mxu1 %v3007_v41  ;;  %v1052_v19 = vpop.f32.mrf.mxu0 }
 0x27e   : > { %1446 = vmatpush1.msra.mxu0 %v2489_v20  ;;  %1958 = vmatpush3.msra.mxu1 %v2542_v36  ;;  %v1053_v21 = vadd.f32 %v1052_v19, %v2712_v58  ;;  %v1124_v36 = vadd.f32 %v2836_v2, %v2723_v47 }
 0x27f   : > { %1447 = vmatprep.subr.mxu0 %v2495_v22  ;;  %1959 = vmatprep.subr.mxu1 %v3007_v41  ;;  %v1054_v20 = vpop.f32.mrf.mxu0 }
 0x280   : > { %1448 = vmatpush1.msra.mxu0 %v2499_v23  ;;  %1960 = vmatpush3.msra.mxu1 %v2552_v39 }
 0x281   : > { %1449 = vmatprep.subr.mxu0 %v2505_v25  ;;  %1961 = vmatprep.subr.mxu1 %v3007_v41 }
 0x282   : > { %1450 = vmatpush1.msra.mxu0 %v2509_v26  ;;  %1962 = vmatpush3.msra.mxu1 %v2562_v42 }
 0x283   : > { %1451 = vmatprep.subr.mxu0 %v2515_v28  ;;  %1963 = vmatprep.subr.mxu1 %v3007_v41  ;;  %v1055_v28 = vadd.f32 %v1054_v20, %v2715_v5 }
 0x284   : > { %1452 = vmatpush1.msra.mxu0 %v2519_v29  ;;  %1964 = vmatpush3.msra.mxu1 %v2572_v45 }
 0x285   : > { %1453 = vmatprep.subr.mxu0 %v2525_v31  ;;  %1965 = vmatprep.subr.mxu1 %v3007_v41 }
 0x286   : > { %1454 = vmatpush1.msra.mxu0 %v2529_v32  ;;  %1966 = vmatpush3.msra.mxu1 %v2582_v48 }
 0x287   : > { %1455 = vmatprep.subr.mxu0 %v2535_v34  ;;  %1967 = vmatprep.subr.mxu1 %v3007_v41 }
 0x288   : > { %1456 = vmatpush1.msra.mxu0 %v2539_v35  ;;  %1968 = vmatpush3.msra.mxu1 %v2592_v51 }
 0x289   : > { %1457 = vmatprep.subr.mxu0 %v2545_v37  ;;  %1969 = vmatprep.subr.mxu1 %v3007_v41 }
 0x28a   : > { %1458 = vmatpush1.msra.mxu0 %v2549_v38  ;;  %1970 = vmatpush3.msra.mxu1 %v3020_v3 }
 0x28b   : > { %1459 = vmatprep.subr.mxu0 %v3021_v4  ;;  %1971 = vmatprep.subr.mxu1 %v3007_v41 }
 0x28c   : > { %1460 = vmatpush1.msra.mxu0 %v3022_v7  ;;  %1972 = vmatpush3.msra.mxu1 %v3023_v8 }
 0x28d   : > { %1461 = vmatprep.subr.mxu0 %v3024_v9  ;;  %1973 = vmatprep.subr.mxu1 %v3007_v41 }
 0x28e   : > { %1462 = vmatpush1.msra.mxu0 %v3025_v10  ;;  %1974 = vmatpush3.msra.mxu1 %v3026_v11 }
 0x28f   : > { %1463 = vmatprep.subr.mxu0 %v3027_v12  ;;  %1975 = vmatprep.subr.mxu1 %v3007_v41 }
 0x290   : > { %1464 = vmatpush1.msra.mxu0 %v3028_v13  ;;  %1976 = vmatpush3.msra.mxu1 %v3029_v14 }
 0x291   : > { %1465 = vmatprep.subr.mxu0 %v3030_v15  ;;  %1977 = vmatprep.subr.mxu1 %v3007_v41 }
 0x292   : > { %1466 = vmatpush1.msra.mxu0 %v3031_v17  ;;  %1499 = vmatprep.mubr.f32.mxu0 %v3007_v41 }
 0x293   : > { %1978 = vmatpush3.msra.mxu1 %v3032_v18  ;;  %1979 = vmatprep.mubr.msk.f32.mxu1 %vm2285_vm1, %v3007_v41 }
 0x32d   : > { %v1193_v22 = vpop.f32.mrf.mxu0  ;;  %v1264_v23 = vpop.f32.mrf.mxu1 }
 0x32e   : > { %v1268_v24 = vadd.f32 %v1193_v22, %v1053_v21  ;;  %v1282_v34 = vadd.f32 %v2721_v49, %v1264_v23 }
 0x32f   : > { %v1939_v25 = vpop.f32.mrf.mxu1  ;;  %v1195_v27 = vpop.f32.mrf.mxu0 }
 0x330   : > { %v1721_v26 = vmul.f32 -1.442695, %v1268_v24  ;;  %v1275_v29 = vadd.f32 %v1195_v27, %v1055_v28 }
 0x332   : > { %2092 = vpow2.f32 %v1721_v26  ;;  %v1722_v30 = vmul.f32 -1.442695, %v1275_v29 }
 0x333   : > { %v1431_v61 = vpop.f32.mrf.mxu1  ;;  %v1360_v46 = vpop.f32.mrf.mxu0 }
 0x334   : > { %2094 = vpow2.f32 %v1722_v30  ;;  %v1361_v1 = vadd.f32 %v1360_v46, %v2712_v58  ;;  %v1432_v58 = vadd.f32 %v1431_v61, %v2723_v47 }
 0x335   : > { %v1946_v41 = vpop.f32.mrf.mxu1  ;;  %v1362_v0 = vpop.f32.mrf.mxu0 }
 0x336   : > { %v1363_v57 = vadd.f32 %v1362_v0, %v2715_v5 }
 0x33f   : > { %v2093_v31 = vpop.eup %2092 }
 0x340   : > { %v1272_v32 = vadd.f32 1.0, %v2093_v31 }
 0x341   : > { %v2095_v33 = vpop.eup %2094 }
 0x342   : > { %2096 = vrcp.f32 %v1272_v32  ;;  %v1279_v39 = vadd.f32 1.0, %v2095_v33 }
 0x34f   : > { %v2097_v35 = vpop.eup %2096 }
 0x350   : > { %v1283_v37 = vmul.f32 %v2097_v35, %v1282_v34 }
 0x352   : > { %v1284_v38 = vadd.f32 %v1283_v37, %v1124_v36 }
 0x354   : > { %2098 = vtanh.f32 %v1284_v38 }
 0x355   : > { %2100 = vrcp.f32 %v1279_v39 }
 0x361   : > { %v2099_v42 = vpop.eup %2098 }
 0x362   : > { %v1286_v45 = vsub.f32 %v2821_v63, %v2099_v42  ;;  %v2101_v48 = vpop.eup %2100 }
 0x364   : > { %v1287_v51 = vmul.f32 %v2101_v48, %v1286_v45 }
 0x366   : > { %v1288_v53 = vadd.f32 %v2099_v42, %v1287_v51 }
 0x368   : > { %1500 = vmatmul.mubr.f32.vlgmr.msra.gmra.mxu0 %v1288_v53  ;;  %1980 = vmatmul.mubr.f32.vlgmr.msra.gmra.mxu1 %v1288_v53 }
 0x428   : > { %v1501_v55 = vpop.f32.mrf.mxu0  ;;  %v1572_v52 = vpop.f32.mrf.mxu1 }
 0x429   : > { %v1576_v59 = vadd.f32 %v1501_v55, %v1361_v1  ;;  %v1590_v63 = vadd.f32 %v2721_v49, %v1572_v52 }
 0x42a   : > { %v1981_v62 = vpop.f32.mrf.mxu1  ;;  %v1503_v6 = vpop.f32.mrf.mxu0 }
 0x42b   : > { %v1726_v60 = vmul.f32 -1.442695, %v1576_v59  ;;  %v1583_v44 = vadd.f32 %v1503_v6, %v1363_v57 }
 0x42d   : > { %2102 = vpow2.f32 %v1726_v60  ;;  %v1727_v43 = vmul.f32 -1.442695, %v1583_v44 }
 0x42f   : > { %2104 = vpow2.f32 %v1727_v43 }
 0x43a   : > { %v2103_v56 = vpop.eup %2102 }
 0x43b   : > { %v1580_v50 = vadd.f32 1.0, %v2103_v56 }
 0x43c   : > { %v2105_v54 = vpop.eup %2104 }
 0x43d   : > { %2106 = vrcp.f32 %v1580_v50  ;;  %v1587_v3 = vadd.f32 1.0, %v2105_v54 }
 0x44a   : > { %v2107_v2 = vpop.eup %2106 }
 0x44b   : > { %v1591_v16 = vmul.f32 %v2107_v2, %v1590_v63 }
 0x44d   : > { %v1592_v40 = vadd.f32 %v1591_v16, %v1432_v58 }
 0x44f   : > { %2108 = vtanh.f32 %v1592_v40 }
 0x450   : > { %2110 = vrcp.f32 %v1587_v3 }
 0x45c   : > { %v2109_v4 = vpop.eup %2108 }
 0x45d   : > { %v1594_v7 = vsub.f32 %v1288_v53, %v2109_v4  ;;  %v2111_v5 = vpop.eup %2110 }
 0x45f   : > { %v1595_v8 = vmul.f32 %v2111_v5, %v1594_v7  ;;  %1601 = sbr.rel (%p1728_p4) target bundleno = 1132 (0x46c), region = 60 }
 0x461   : > { %v1596_v9 = vadd.f32 %v2109_v4, %v1595_v8 }
 0x463   : > { %1597 = vst [vmem:[#allocation2] sm:$0xff] %v1596_v9 }
 0x46a   : > { %v1602_v10 = vld [vmem:[#allocation2] sm:$0xff] }
 0x46b   : > { %1603 = vst [vmem:[#allocation9] sm:$0xff] %v1602_v10 }
 0x46c PF: > { %p2919_p2 = scmp.eq.s32.totalorder %s1695_s24, 1  ;;  %s2286_s12 = smov [#allocation9]  }
 0x46d   : > { %s1613_s13 = sshll.u32 %s2286_s12, 4  ;;  %s1614_s13 = int_to_ptr.vmem [resolvable:$true] %s1613_s13 }
 0x46e   : > { %s2192_s14 = scalar_lea.vmem %s1614_s13, 128  ;;  %p2199_p9 = scmp.lt.s32.totalorder %s1614_s13, %s1614_s13 }
 0x46f   : > { %p2193_p3 = scmp.ne.s32.totalorder %s1614_s13, %s2192_s14  ;;  %p2200_p10 = scmp.lt.s32.totalorder %s2192_s14, %s2192_s14 }
 0x471   : > { %p2194_p7 = pnand %p2193_p3, %p2919_p2  ;;  %p2201_p12 = por %p2200_p10, %p2199_p9 }
 0x473   : > { %p2195_p6 = pneg %p2194_p7 }
 0x475   : > { %p2202_p11 = pnand %p2201_p12, %p2195_p6 }
 0x477   : > { %2205 = shalt.err (!%p2202_p11)
}
 0x478   : > { %1993 = dma.vmem_to_hbm [thread:$0]  (%p2919_p2), %s1614_s13, 128, %s2957_s5, [#allocation5]  }
 0x479   : > { %2249 = dma.done.wait (%p2919_p2), [#allocation5], 128  }
 0x47a   : > { %2251 = vsyncadd (%p2919_p2), [#allocation5], 4294967168 }
 0x47b PF: > { %s20_s23 = sadd.s32 1, %s2274_s23   ;;  %s3034_s18 = smov %s2258_s19 }
 0x47c   : > { %p17_p1 = scmp.ge.s32.totalorder %s20_s23, 4   ;;  %s3035_s19 = smov %s2262_s20 }
 0x47d   : > { %s3036_s20 = smov %s2404_s6  ;;  %s3037_s21 = smov %s2270_s22 }
 0x47e   : > { %s3038_s22 = smov %s3040_s16  ;;  %19 = sbr.rel (!%p17_p1) target bundleno = 6 (0x6), region = 97 }
 0x483   :  { %1626 = vsyncpa [#allocation4], 1 }
 0x484   :  { %1628 = vsyncpa [#allocation4 + $0x1], 1 }
 0x485   :  { %1629 = vsyncpa [#allocation7], 1 }
 0x486   :  { %1630 = vsyncpa [#allocation5], 1 }
 0x487   :  { %1632 = vsyncpa [#allocation5 + $0x1], 1 }

</bundles_post_ra>
